<compile_context>
chip_gen: v5e
topology: v5e:2x2
jax: 0.10.0
libtpu: 0.0.40
codegen_flags: <defaults>
</compile_context>

<pallas_src>
import jax
import jax.numpy as jnp
from jax import lax
from jax.experimental import pallas as pl
from jax.experimental.pallas import tpu as pltpu

LANE = 128


def _round_up(x, m):
    return (x + m - 1) // m * m


def _cdiv(a, b):
    return -(-a // b)


def _vmem_limit_bytes():
    # v5e/v6e: 128 MiB physical VMEM; v7x: 64 MiB per TensorCore. Use ~3/4 of it.
    cap = 64 * 1024 * 1024
    try:
        info = pltpu.get_tpu_info()
        cap = int(getattr(info, "vmem_capacity_bytes", cap))
    except Exception:
        pass
    return max(16 * 1024 * 1024, min(cap * 3 // 4, 100 * 1024 * 1024))


_VMEM_LIMIT = _vmem_limit_bytes()


def _pick_row_tile(n, hpad, *, cap=512, vmem_limit=_VMEM_LIMIT):
    """Row tile for the adjacency slab: as large as the VMEM budget allows (<= cap),
    rounded so the (padded) row count splits into >= 2 tiles when there is enough work."""
    # Resident operands: proj (n, hpad) bf16, attention fc weight^T (hpad, hpad) bf16, biases.
    resident = n * hpad * 2 + hpad * hpad * 2 + 4 * hpad * 4
    # Per output row (double-buffered): adj slab bf16 + embedding output bf16 (+ tiny colsum).
    per_row = 2 * n * 2 + 2 * hpad * 2
    budget = int(vmem_limit * 0.8) - resident
    # TODO(synk): for very large N the resident proj no longer fits; add a K-tiling
    # ("arbitrary") grid axis over adj columns / proj rows with a VMEM f32 accumulator.
    tm = budget // per_row if budget > 0 else 8
    tm = min(int(tm), cap)
    tm = max(8, tm - tm % 8)

    n8 = _round_up(n, 8)
    num_tiles = max(1, _cdiv(n8, tm))
    if num_tiles == 1 and n8 > 16:
        num_tiles = 2                       # keep >= 2 grid steps (v7x megacore split)
    tm = _round_up(_cdiv(n8, num_tiles), 8)
    return tm


def prepare_adjacencies(mps, hidden):
    """One-time setup: cast each dense (row-normalized) adjacency to bf16 and pad its rows
    to a multiple of the row tile. Do this OUTSIDE the jitted forward so the N^2 cast is
    not an extra HBM pass on every call."""
    hpad = _round_up(hidden, LANE)
    out = []
    for adj in mps:
        n = adj.shape[0]
        tm = _pick_row_tile(n, hpad)
        n_pad = _round_up(n, tm)
        a = adj.astype(jnp.bfloat16)
        if n_pad != n:
            a = jnp.zeros((n_pad, n), jnp.bfloat16).at[:n, :].set(a)
        out.append(a)
    return out


# ---------------------------------------------------------------------------
# Fused GCN + attention pass-1 kernel:
#   emb     = PReLU(adj_tile @ proj + bias)                (stored bf16)
#   colsum  = sum_rows tanh(emb @ wfc^T + bfc)             (per-tile partial, f32)
# ---------------------------------------------------------------------------
def _make_gcn_attn_kernel(tm, n, n_pad):
    mask_rows = n_pad > n

    def kernel(adj_ref, proj_ref, bias_ref, wfct_ref, bfc_ref, alpha_ref,
               emb_ref, colsum_ref):
        # adj_ref   : (TM, N)       bf16  (pipelined row slab of the adjacency)
        # proj_ref  : (N, HPAD)     bf16  (resident; seq @ W.T, zero-padded columns)
        # bias_ref  : (1, HPAD)     f32   (resident)
        # wfct_ref  : (HPAD, HPAD)  bf16  (resident; attention fc weight^T, padded)
        # bfc_ref   : (1, HPAD)     f32   (resident)
        # alpha_ref : (1, 1)        f32   SMEM (PReLU slope)
        # emb_ref   : (TM, HPAD)    bf16  output (GCN embedding tile)
        # colsum_ref: (1, HPAD)     f32   output (per-row-tile partial column sum)
        out = jnp.dot(adj_ref[...], proj_ref[...],
                      preferred_element_type=jnp.float32)           # (TM, HPAD)
        out = out + bias_ref[...]
        a = alpha_ref[0, 0]
        emb = jnp.where(out > 0, out, a * out)                      # PReLU
        emb_bf = emb.astype(jnp.bfloat16)
        emb_ref[...] = emb_bf

        # Fused attention pass 1 (rides in MXU/EUP slack of the HBM-bound adj loop).
        h = jnp.dot(emb_bf, wfct_ref[...],
                    preferred_element_type=jnp.float32)             # (TM, HPAD)
        h = jnp.tanh(h + bfc_ref[...])
        if mask_rows:
            row = pl.program_id(0) * tm + lax.broadcasted_iota(jnp.int32, h.shape, 0)
            h = jnp.where(row < n, h, 0.0)                          # drop padded rows
        colsum_ref[...] = jnp.sum(h, axis=0, keepdims=True)

    return kernel


def gcn_attn_colsum(adj_pad, proj_pad, bias_pad, wfct_pad, bfc_pad, alpha, *, n, tm):
    """One metapath. Returns (emb (n_pad, hpad) bf16, colsum (n_tiles, 1, hpad) f32)."""
    n_pad, n_cols = adj_pad.shape
    assert n_cols == n and n_pad % tm == 0
    hpad = proj_pad.shape[1]
    n_tiles = n_pad // tm
    alpha2d = jnp.asarray(alpha, jnp.float32).reshape(1, 1)

    flops = 2 * n_pad * n * hpad + 2 * n_pad * hpad * hpad
    bytes_accessed = ((adj_pad.size + proj_pad.size + wfct_pad.size) * 2
                      + n_pad * hpad * 2 + (n_tiles + 3) * hpad * 4)

    kernel = _make_gcn_attn_kernel(tm, n, n_pad)
    emb, colsum = pl.pallas_call(
        kernel,
        out_shape=(jax.ShapeDtypeStruct((n_pad, hpad), jnp.bfloat16),
                   jax.ShapeDtypeStruct((n_tiles, 1, hpad), jnp.float32)),
        grid=(n_tiles,),
        in_specs=[
            pl.BlockSpec((tm, n), lambda i: (i, 0)),          # adj row slab (pipelined)
            pl.BlockSpec((n, hpad), lambda i: (0, 0)),        # proj (resident)
            pl.BlockSpec((1, hpad), lambda i: (0, 0)),        # GCN bias (resident)
            pl.BlockSpec((hpad, hpad), lambda i: (0, 0)),     # attention fc weight^T
            pl.BlockSpec((1, hpad), lambda i: (0, 0)),        # attention fc bias
            pl.BlockSpec(memory_space=pltpu.SMEM),            # PReLU slope
        ],
        out_specs=(
            pl.BlockSpec((tm, hpad), lambda i: (i, 0)),
            pl.BlockSpec((None, 1, hpad), lambda i: (i, 0, 0)),
        ),
        compiler_params=pltpu.CompilerParams(
            dimension_semantics=("parallel",),
            vmem_limit_bytes=_VMEM_LIMIT),
        cost_estimate=pl.CostEstimate(flops=int(flops),
                                      transcendentals=int(n_pad * hpad),
                                      bytes_accessed=int(bytes_accessed)),
    )(adj_pad, proj_pad, bias_pad, wfct_pad, bfc_pad, alpha2d)
    return emb, colsum


# ---------------------------------------------------------------------------
# Attention combine: z = sum_p beta_p * emb_p, written unpadded (N, hidden) f32.
# ---------------------------------------------------------------------------
def _attn_combine_kernel(beta_ref, *refs):
    # beta_ref : (P,)        f32  SMEM
    # refs[:-1]: (TM, HPAD)  bf16 per-metapath embedding tiles
    # refs[-1] : (TM, H)     f32  output (un-padded hidden columns only)
    emb_refs, out_ref = refs[:-1], refs[-1]
    hidden = out_ref.shape[-1]
    acc = beta_ref[0] * emb_refs[0][...].astype(jnp.float32)
    for p in range(1, len(emb_refs)):
        acc = acc + beta_ref[p] * emb_refs[p][...].astype(jnp.float32)
    out_ref[...] = acc[:, :hidden]


def attn_combine(beta, embs, *, n, hidden, tm):
    n_pad, hpad = embs[0].shape
    z = pl.pallas_call(
        _attn_combine_kernel,
        out_shape=jax.ShapeDtypeStruct((n_pad, hidden), jnp.float32),
        grid=(n_pad // tm,),
        in_specs=([pl.BlockSpec(memory_space=pltpu.SMEM)]
                  + [pl.BlockSpec((tm, hpad), lambda i: (i, 0)) for _ in embs]),
        out_specs=pl.BlockSpec((tm, hidden), lambda i: (i, 0)),
        compiler_params=pltpu.CompilerParams(
            dimension_semantics=("parallel",),
            vmem_limit_bytes=_VMEM_LIMIT),
    )(beta, *embs)
    return z[:n] if n_pad != n else z


# ---------------------------------------------------------------------------
# MP_encoder forward
# ---------------------------------------------------------------------------
def mp_encoder_forward(h_d, h_p, adjs_d, adjs_p, params):
    """adjs_* must come from prepare_adjacencies (bf16, rows padded to the tile grid)."""
    hidden = h_d.shape[1]
    hpad = _round_up(hidden, LANE)

    def branch(h, adjs, gcn_params, att_params):
        n = h.shape[0]
        tm = _pick_row_tile(n, hpad)
        wfc, bfc, att = att_params
        wfct_p = jnp.zeros((hpad, hpad), jnp.bfloat16).at[:hidden, :hidden].set(
            wfc.T.astype(jnp.bfloat16))
        bfc_p = jnp.zeros((1, hpad), jnp.float32).at[0, :hidden].set(
            bfc.astype(jnp.float32))
        att_v = jnp.zeros((hpad,), jnp.float32).at[:hidden].set(
            att.reshape(-1).astype(jnp.float32))

        embs, colsums = [], []
        for adj_pad, (w, b, alpha) in zip(adjs, gcn_params):
            assert adj_pad.shape == (_round_up(n, tm), n)
            # Per-metapath projection seq @ W.T (tiny; fused by XLA inside the jit).
            proj = jnp.zeros((n, hpad), jnp.float32).at[:, :hidden].set(
                h @ w.T).astype(jnp.bfloat16)
            bias_p = jnp.zeros((1, hpad), jnp.float32).at[0, :hidden].set(
                b.astype(jnp.float32))
            emb, cs = gcn_attn_colsum(adj_pad, proj, bias_p, wfct_p, bfc_p, alpha,
                                      n=n, tm=tm)
            embs.append(emb)
            colsums.append(cs)

        # Attention logits from the fused per-tile partials (mean over the N real rows).
        s = [jnp.sum(cs, axis=(0, 1)) / jnp.float32(n) for cs in colsums]
        logits = jnp.stack([jnp.sum(si * att_v) for si in s])
        beta = jax.nn.softmax(logits)
        # TODO(synk): attention dropout (attn_drop > 0, training mode) not implemented;
        # attn_drop = 0 / eval mode => identity, which is what is modelled here.
        return attn_combine(beta, embs, n=n, hidden=hidden, tm=tm)

    z_d = branch(h_d, adjs_d, params["dg_gcn"], params["dg_att"])
    z_p = branch(h_p, adjs_p, params["pt_gcn"], params["pt_att"])
    return z_d, z_p


mp_encoder_forward_jit = jax.jit(mp_encoder_forward)


# ---------------------------------------------------------------------------
# Plain-JAX reference (PyTorch math in f32)
# ---------------------------------------------------------------------------
def _gcn_ref(seq, adj, w, b, a):
    out = adj @ (seq @ w.T) + b
    return jnp.where(out > 0, out, a * out)


def _attention_ref(embeds, wfc, bfc, att):
    logits = jnp.stack([
        jnp.sum(att.reshape(-1) * jnp.mean(jnp.tanh(e @ wfc.T + bfc), axis=0))
        for e in embeds
    ])
    beta = jax.nn.softmax(logits)
    z = jnp.zeros_like(embeds[0])
    for i, e in enumerate(embeds):
        z = z + beta[i] * e
    return z


def _mp_encoder_ref(h_d, h_p, mps_d, mps_p, params):
    def branch(h, mps, gcn_params, att_params):
        embeds = [_gcn_ref(h, adj, w, b, a) for adj, (w, b, a) in zip(mps, gcn_params)]
        return _attention_ref(embeds, *att_params)
    return (branch(h_d, mps_d, params["dg_gcn"], params["dg_att"]),
            branch(h_p, mps_p, params["pt_gcn"], params["pt_att"]))


if __name__ == "__main__":
    # Small shapes: N_D drug nodes, N_P protein nodes, hidden dim, metapath counts.
    # N_P = 200 deliberately exercises the row-padding + masked-colsum path.
    N_D, N_P, HIDDEN = 256, 200, 64
    P_D, P_P = 2, 3

    key = jax.random.PRNGKey(0)
    kit = iter(jax.random.split(key, 32))

    def xavier_normal(k, shape, gain=1.414):
        fan_out, fan_in = shape
        std = gain * (2.0 / (fan_in + fan_out)) ** 0.5
        return std * jax.random.normal(k, shape, dtype=jnp.float32)

    h_d = jax.random.normal(next(kit), (N_D, HIDDEN), dtype=jnp.float32)
    h_p = jax.random.normal(next(kit), (N_P, HIDDEN), dtype=jnp.float32)

    def make_adj(k, n):
        a = jax.random.uniform(k, (n, n), dtype=jnp.float32)
        return a / jnp.sum(a, axis=1, keepdims=True)   # row-normalized dense adjacency

    mps_d = [make_adj(next(kit), N_D) for _ in range(P_D)]
    mps_p = [make_adj(next(kit), N_P) for _ in range(P_P)]

    def make_gcn(k):
        w = xavier_normal(k, (HIDDEN, HIDDEN))          # xavier_normal_, gain=1.414
        b = jnp.zeros((HIDDEN,), jnp.float32)           # bias.data.fill_(0.0)
        alpha = jnp.float32(0.25)                       # nn.PReLU() default slope
        return (w, b, alpha)

    def make_att(k1, k2, k3):
        wfc = xavier_normal(k1, (HIDDEN, HIDDEN))
        bfc = 0.01 * jax.random.normal(k2, (HIDDEN,), dtype=jnp.float32)
        att = xavier_normal(k3, (1, HIDDEN))
        return (wfc, bfc, att)

    params = {
        "dg_gcn": [make_gcn(next(kit)) for _ in range(P_D)],
        "pt_gcn": [make_gcn(next(kit)) for _ in range(P_P)],
        "dg_att": make_att(next(kit), next(kit), next(kit)),
        "pt_att": make_att(next(kit), next(kit), next(kit)),
    }

    # One-time setup: bf16 + row-padded adjacencies (kept across forward calls).
    adjs_d = prepare_adjacencies(mps_d, HIDDEN)
    adjs_p = prepare_adjacencies(mps_p, HIDDEN)

    z_d, z_p = mp_encoder_forward_jit(h_d, h_p, adjs_d, adjs_p, params)
    z_d = jax.block_until_ready(z_d)
    z_p = jax.block_until_ready(z_p)

    z_d_ref, z_p_ref = _mp_encoder_ref(h_d, h_p, mps_d, mps_p, params)

    assert z_d.shape == (N_D, HIDDEN) and z_p.shape == (N_P, HIDDEN)
    # bf16 MXU inputs / bf16 stored embeddings -> looser tolerance vs the f32 reference.
    assert jnp.allclose(z_d, z_d_ref, atol=2e-2, rtol=2e-2), \
        float(jnp.max(jnp.abs(z_d - z_d_ref)))
    assert jnp.allclose(z_p, z_p_ref, atol=2e-2, rtol=2e-2), \
        float(jnp.max(jnp.abs(z_p - z_p_ref)))

    print("KERNEL_OK")
</pallas_src>

<mosaic_0001>
module attributes {stable_mosaic.version = 11 : i64} {
  func.func @kernel(%arg0: i32, %arg1: memref<104x200xbf16, #tpu.memory_space<vmem>>, %arg2: memref<200x128xbf16, #tpu.memory_space<vmem>>, %arg3: memref<1x128xf32, #tpu.memory_space<vmem>>, %arg4: memref<128x128xbf16, #tpu.memory_space<vmem>>, %arg5: memref<1x128xf32, #tpu.memory_space<vmem>>, %arg6: memref<1x1xf32, #tpu.memory_space<smem>>, %arg7: memref<104x128xbf16, #tpu.memory_space<vmem>>, %arg8: memref<1x1x128xf32, #tpu.memory_space<vmem>>) attributes {dimension_semantics = [#tpu.dimension_semantics<parallel>], iteration_bounds = array<i64: 2>, scalar_prefetch = 0 : i64, scratch_operands = 0 : i64, tpu.core_type = #tpu.core_type<tc>, window_params = [{transform_indices = @transform_0, window_bounds = array<i64: 104, 200>}, {pipeline_mode = #tpu.pipeline_mode<synchronous>, transform_indices = @transform_1, window_bounds = array<i64: 200, 128>}, {pipeline_mode = #tpu.pipeline_mode<synchronous>, transform_indices = @transform_2, window_bounds = array<i64: 1, 128>}, {pipeline_mode = #tpu.pipeline_mode<synchronous>, transform_indices = @transform_3, window_bounds = array<i64: 128, 128>}, {pipeline_mode = #tpu.pipeline_mode<synchronous>, transform_indices = @transform_4, window_bounds = array<i64: 1, 128>}, {transform_indices = @transform_5, window_bounds = array<i64: 1, 1>}, {transform_indices = @transform_6, window_bounds = array<i64: 104, 128>}, {transform_indices = @transform_7, window_bounds = array<i64: 1, 1, 128>}]} {
    %c0 = arith.constant 0 : index
    %c0_0 = arith.constant 0 : index
    %0 = vector.load %arg1[%c0, %c0_0] : memref<104x200xbf16, #tpu.memory_space<vmem>>, vector<104x200xbf16>
    %c0_1 = arith.constant 0 : index
    %c0_2 = arith.constant 0 : index
    %1 = vector.load %arg2[%c0_1, %c0_2] : memref<200x128xbf16, #tpu.memory_space<vmem>>, vector<200x128xbf16>
    %cst = arith.constant dense<0.000000e+00> : vector<104x128xf32>
    %2 = tpu.matmul %0, %1, %cst {dimension_numbers = #tpu.dot_dimension_numbers<[1], [0], [0], [1], [0, 0, 1, 1], [], []>} : vector<104x200xbf16>, vector<200x128xbf16>, vector<104x128xf32> -> vector<104x128xf32>
    %c0_3 = arith.constant 0 : index
    %c0_4 = arith.constant 0 : index
    %3 = vector.load %arg3[%c0_3, %c0_4] : memref<1x128xf32, #tpu.memory_space<vmem>>, vector<1x128xf32>
    %4 = vector.broadcast %3 : vector<1x128xf32> to vector<104x128xf32>
    %5 = arith.addf %2, %4 : vector<104x128xf32>
    %c0_5 = arith.constant 0 : index
    %c0_6 = arith.constant 0 : index
    %6 = memref.load %arg6[%c0_5, %c0_6] : memref<1x1xf32, #tpu.memory_space<smem>>
    %cst_7 = arith.constant 0.000000e+00 : f32
    %7 = vector.broadcast %cst_7 : f32 to vector<104x128xf32>
    %8 = arith.cmpf ogt, %5, %7 : vector<104x128xf32>
    %9 = vector.broadcast %6 : f32 to vector<104x128xf32>
    %10 = arith.mulf %9, %5 : vector<104x128xf32>
    %11 = arith.select %8, %5, %10 : vector<104x128xi1>, vector<104x128xf32>
    %12 = arith.truncf %11 : vector<104x128xf32> to vector<104x128xbf16>
    %c0_8 = arith.constant 0 : index
    %c0_9 = arith.constant 0 : index
    %13 = vector.load %arg7[%c0_8, %c0_9] : memref<104x128xbf16, #tpu.memory_space<vmem>>, vector<104x128xbf16>
    tpu.vector_store %arg7[%c0_8, %c0_9], %12 {strides = array<i32>} : memref<104x128xbf16, #tpu.memory_space<vmem>>, vector<104x128xbf16>,
    %c0_10 = arith.constant 0 : index
    %c0_11 = arith.constant 0 : index
    %14 = vector.load %arg4[%c0_10, %c0_11] : memref<128x128xbf16, #tpu.memory_space<vmem>>, vector<128x128xbf16>
    %cst_12 = arith.constant dense<0.000000e+00> : vector<104x128xf32>
    %15 = tpu.matmul %12, %14, %cst_12 {dimension_numbers = #tpu.dot_dimension_numbers<[1], [0], [0], [1], [0, 0, 1, 1], [], []>} : vector<104x128xbf16>, vector<128x128xbf16>, vector<104x128xf32> -> vector<104x128xf32>
    %c0_13 = arith.constant 0 : index
    %c0_14 = arith.constant 0 : index
    %16 = vector.load %arg5[%c0_13, %c0_14] : memref<1x128xf32, #tpu.memory_space<vmem>>, vector<1x128xf32>
    %17 = vector.broadcast %16 : vector<1x128xf32> to vector<104x128xf32>
    %18 = arith.addf %15, %17 : vector<104x128xf32>
    %19 = math.tanh %18 : vector<104x128xf32>
    %c104_i32 = arith.constant 104 : i32
    %20 = arith.muli %arg0, %c104_i32 : i32
    %21 = tpu.iota {dimensions = array<i32: 0>} : vector<104x128xi32>
    %22 = vector.broadcast %20 : i32 to vector<104x128xi32>
    %23 = arith.addi %22, %21 : vector<104x128xi32>
    %c200_i32 = arith.constant 200 : i32
    %24 = vector.broadcast %c200_i32 : i32 to vector<104x128xi32>
    %25 = arith.cmpi slt, %23, %24 : vector<104x128xi32>
    %cst_15 = arith.constant 0.000000e+00 : f32
    %26 = vector.broadcast %cst_15 : f32 to vector<104x128xf32>
    %27 = arith.select %25, %19, %26 : vector<104x128xi1>, vector<104x128xf32>
    %cst_16 = arith.constant dense<0.000000e+00> : vector<128xf32>
    %28 = vector.multi_reduction <add>, %27, %cst_16 [0] : vector<104x128xf32> to vector<128xf32>
    %29 = vector.shape_cast %28 : vector<128xf32> to vector<1x128xf32>
    %c0_17 = arith.constant 0 : index
    %c0_18 = arith.constant 0 : index
    %c0_19 = arith.constant 0 : index
    %30 = vector.load %arg8[%c0_17, %c0_18, %c0_19] : memref<1x1x128xf32, #tpu.memory_space<vmem>>, vector<1x1x128xf32>
    %31 = vector.shape_cast %30 : vector<1x1x128xf32> to vector<1x128xf32>
    %32 = vector.shape_cast %29 : vector<1x128xf32> to vector<1x1x128xf32>
    tpu.vector_store %arg8[%c0_17, %c0_18, %c0_19], %32 {strides = array<i32>} : memref<1x1x128xf32, #tpu.memory_space<vmem>>, vector<1x1x128xf32>,
    return
  }
  func.func @transform_0(%arg0: i32) -> (i32, i32) {
    %c0_i32 = arith.constant 0 : i32
    %c0_i32_0 = arith.constant 0 : i32
    return %arg0, %c0_i32 : i32, i32
  }
  func.func @transform_1(%arg0: i32) -> (i32, i32) {
    %c0_i32 = arith.constant 0 : i32
    %c0_i32_0 = arith.constant 0 : i32
    %c0_i32_1 = arith.constant 0 : i32
    return %c0_i32, %c0_i32_0 : i32, i32
  }
  func.func @transform_2(%arg0: i32) -> (i32, i32) {
    %c0_i32 = arith.constant 0 : i32
    %c0_i32_0 = arith.constant 0 : i32
    %c0_i32_1 = arith.constant 0 : i32
    return %c0_i32, %c0_i32_0 : i32, i32
  }
  func.func @transform_3(%arg0: i32) -> (i32, i32) {
    %c0_i32 = arith.constant 0 : i32
    %c0_i32_0 = arith.constant 0 : i32
    %c0_i32_1 = arith.constant 0 : i32
    return %c0_i32, %c0_i32_0 : i32, i32
  }
  func.func @transform_4(%arg0: i32) -> (i32, i32) {
    %c0_i32 = arith.constant 0 : i32
    %c0_i32_0 = arith.constant 0 : i32
    %c0_i32_1 = arith.constant 0 : i32
    return %c0_i32, %c0_i32_0 : i32, i32
  }
  func.func @transform_5(%arg0: i32) -> (i32, i32) {
    %c0_i32 = arith.constant 0 : i32
    %c0_i32_0 = arith.constant 0 : i32
    %c0_i32_1 = arith.constant 0 : i32
    return %c0_i32, %c0_i32_0 : i32, i32
  }
  func.func @transform_6(%arg0: i32) -> (i32, i32) {
    %c0_i32 = arith.constant 0 : i32
    %c0_i32_0 = arith.constant 0 : i32
    return %arg0, %c0_i32 : i32, i32
  }
  func.func @transform_7(%arg0: i32) -> (i32, i32, i32) {
    %c0_i32 = arith.constant 0 : i32
    %c0_i32_0 = arith.constant 0 : i32
    %c0_i32_1 = arith.constant 0 : i32
    return %arg0, %c0_i32, %c0_i32_0 : i32, i32, i32
  }
}

module attributes {stable_mosaic.version = 11 : i64} {
  func.func @_attn_combine_kernel(%arg0: i32, %arg1: memref<3xf32, #tpu.memory_space<smem>>, %arg2: memref<104x128xbf16, #tpu.memory_space<vmem>>, %arg3: memref<104x128xbf16, #tpu.memory_space<vmem>>, %arg4: memref<104x128xbf16, #tpu.memory_space<vmem>>, %arg5: memref<104x64xf32, #tpu.memory_space<vmem>>) attributes {dimension_semantics = [#tpu.dimension_semantics<parallel>], iteration_bounds = array<i64: 2>, scalar_prefetch = 0 : i64, scratch_operands = 0 : i64, tpu.core_type = #tpu.core_type<tc>, window_params = [{transform_indices = @transform_0, window_bounds = array<i64: 3>}, {transform_indices = @transform_1, window_bounds = array<i64: 104, 128>}, {transform_indices = @transform_2, window_bounds = array<i64: 104, 128>}, {transform_indices = @transform_3, window_bounds = array<i64: 104, 128>}, {transform_indices = @transform_4, window_bounds = array<i64: 104, 64>}]} {
    %c0 = arith.constant 0 : index
    %0 = memref.load %arg1[%c0] : memref<3xf32, #tpu.memory_space<smem>>
    %c0_0 = arith.constant 0 : index
    %c0_1 = arith.constant 0 : index
    %1 = vector.load %arg2[%c0_0, %c0_1] : memref<104x128xbf16, #tpu.memory_space<vmem>>, vector<104x128xbf16>
    %2 = arith.extf %1 : vector<104x128xbf16> to vector<104x128xf32>
    %3 = vector.broadcast %0 : f32 to vector<104x128xf32>
    %4 = arith.mulf %3, %2 : vector<104x128xf32>
    %c1 = arith.constant 1 : index
    %5 = memref.load %arg1[%c1] : memref<3xf32, #tpu.memory_space<smem>>
    %c0_2 = arith.constant 0 : index
    %c0_3 = arith.constant 0 : index
    %6 = vector.load %arg3[%c0_2, %c0_3] : memref<104x128xbf16, #tpu.memory_space<vmem>>, vector<104x128xbf16>
    %7 = arith.extf %6 : vector<104x128xbf16> to vector<104x128xf32>
    %8 = vector.broadcast %5 : f32 to vector<104x128xf32>
    %9 = arith.mulf %8, %7 : vector<104x128xf32>
    %10 = arith.addf %4, %9 : vector<104x128xf32>
    %c2 = arith.constant 2 : index
    %11 = memref.load %arg1[%c2] : memref<3xf32, #tpu.memory_space<smem>>
    %c0_4 = arith.constant 0 : index
    %c0_5 = arith.constant 0 : index
    %12 = vector.load %arg4[%c0_4, %c0_5] : memref<104x128xbf16, #tpu.memory_space<vmem>>, vector<104x128xbf16>
    %13 = arith.extf %12 : vector<104x128xbf16> to vector<104x128xf32>
    %14 = vector.broadcast %11 : f32 to vector<104x128xf32>
    %15 = arith.mulf %14, %13 : vector<104x128xf32>
    %16 = arith.addf %10, %15 : vector<104x128xf32>
    %17 = vector.extract_strided_slice %16 {offsets = [0, 0], sizes = [104, 64], strides = [1, 1]} : vector<104x128xf32> to vector<104x64xf32>
    %c0_6 = arith.constant 0 : index
    %c0_7 = arith.constant 0 : index
    %18 = vector.load %arg5[%c0_6, %c0_7] : memref<104x64xf32, #tpu.memory_space<vmem>>, vector<104x64xf32>
    tpu.vector_store %arg5[%c0_6, %c0_7], %17 {strides = array<i32>} : memref<104x64xf32, #tpu.memory_space<vmem>>, vector<104x64xf32>,
    return
  }
  func.func @transform_0(%arg0: i32) -> i32 {
    %c0_i32 = arith.constant 0 : i32
    %c0_i32_0 = arith.constant 0 : i32
    return %c0_i32 : i32
  }
  func.func @transform_1(%arg0: i32) -> (i32, i32) {
    %c0_i32 = arith.constant 0 : i32
    %c0_i32_0 = arith.constant 0 : i32
    return %arg0, %c0_i32 : i32, i32
  }
  func.func @transform_2(%arg0: i32) -> (i32, i32) {
    %c0_i32 = arith.constant 0 : i32
    %c0_i32_0 = arith.constant 0 : i32
    return %arg0, %c0_i32 : i32, i32
  }
  func.func @transform_3(%arg0: i32) -> (i32, i32) {
    %c0_i32 = arith.constant 0 : i32
    %c0_i32_0 = arith.constant 0 : i32
    return %arg0, %c0_i32 : i32, i32
  }
  func.func @transform_4(%arg0: i32) -> (i32, i32) {
    %c0_i32 = arith.constant 0 : i32
    %c0_i32_0 = arith.constant 0 : i32
    return %arg0, %c0_i32 : i32, i32
  }
}

module attributes {stable_mosaic.version = 11 : i64} {
  func.func @kernel(%arg0: i32, %arg1: memref<128x256xbf16, #tpu.memory_space<vmem>>, %arg2: memref<256x128xbf16, #tpu.memory_space<vmem>>, %arg3: memref<1x128xf32, #tpu.memory_space<vmem>>, %arg4: memref<128x128xbf16, #tpu.memory_space<vmem>>, %arg5: memref<1x128xf32, #tpu.memory_space<vmem>>, %arg6: memref<1x1xf32, #tpu.memory_space<smem>>, %arg7: memref<128x128xbf16, #tpu.memory_space<vmem>>, %arg8: memref<1x1x128xf32, #tpu.memory_space<vmem>>) attributes {dimension_semantics = [#tpu.dimension_semantics<parallel>], iteration_bounds = array<i64: 2>, scalar_prefetch = 0 : i64, scratch_operands = 0 : i64, tpu.core_type = #tpu.core_type<tc>, window_params = [{transform_indices = @transform_0, window_bounds = array<i64: 128, 256>}, {pipeline_mode = #tpu.pipeline_mode<synchronous>, transform_indices = @transform_1, window_bounds = array<i64: 256, 128>}, {pipeline_mode = #tpu.pipeline_mode<synchronous>, transform_indices = @transform_2, window_bounds = array<i64: 1, 128>}, {pipeline_mode = #tpu.pipeline_mode<synchronous>, transform_indices = @transform_3, window_bounds = array<i64: 128, 128>}, {pipeline_mode = #tpu.pipeline_mode<synchronous>, transform_indices = @transform_4, window_bounds = array<i64: 1, 128>}, {transform_indices = @transform_5, window_bounds = array<i64: 1, 1>}, {transform_indices = @transform_6, window_bounds = array<i64: 128, 128>}, {transform_indices = @transform_7, window_bounds = array<i64: 1, 1, 128>}]} {
    %c0 = arith.constant 0 : index
    %c0_0 = arith.constant 0 : index
    %0 = vector.load %arg1[%c0, %c0_0] : memref<128x256xbf16, #tpu.memory_space<vmem>>, vector<128x256xbf16>
    %c0_1 = arith.constant 0 : index
    %c0_2 = arith.constant 0 : index
    %1 = vector.load %arg2[%c0_1, %c0_2] : memref<256x128xbf16, #tpu.memory_space<vmem>>, vector<256x128xbf16>
    %cst = arith.constant dense<0.000000e+00> : vector<128x128xf32>
    %2 = tpu.matmul %0, %1, %cst {dimension_numbers = #tpu.dot_dimension_numbers<[1], [0], [0], [1], [0, 0, 1, 1], [], []>} : vector<128x256xbf16>, vector<256x128xbf16>, vector<128x128xf32> -> vector<128x128xf32>
    %c0_3 = arith.constant 0 : index
    %c0_4 = arith.constant 0 : index
    %3 = vector.load %arg3[%c0_3, %c0_4] : memref<1x128xf32, #tpu.memory_space<vmem>>, vector<1x128xf32>
    %4 = vector.broadcast %3 : vector<1x128xf32> to vector<128x128xf32>
    %5 = arith.addf %2, %4 : vector<128x128xf32>
    %c0_5 = arith.constant 0 : index
    %c0_6 = arith.constant 0 : index
    %6 = memref.load %arg6[%c0_5, %c0_6] : memref<1x1xf32, #tpu.memory_space<smem>>
    %cst_7 = arith.constant 0.000000e+00 : f32
    %7 = vector.broadcast %cst_7 : f32 to vector<128x128xf32>
    %8 = arith.cmpf ogt, %5, %7 : vector<128x128xf32>
    %9 = vector.broadcast %6 : f32 to vector<128x128xf32>
    %10 = arith.mulf %9, %5 : vector<128x128xf32>
    %11 = arith.select %8, %5, %10 : vector<128x128xi1>, vector<128x128xf32>
    %12 = arith.truncf %11 : vector<128x128xf32> to vector<128x128xbf16>
    %c0_8 = arith.constant 0 : index
    %c0_9 = arith.constant 0 : index
    %13 = vector.load %arg7[%c0_8, %c0_9] : memref<128x128xbf16, #tpu.memory_space<vmem>>, vector<128x128xbf16>
    tpu.vector_store %arg7[%c0_8, %c0_9], %12 {strides = array<i32>} : memref<128x128xbf16, #tpu.memory_space<vmem>>, vector<128x128xbf16>,
    %c0_10 = arith.constant 0 : index
    %c0_11 = arith.constant 0 : index
    %14 = vector.load %arg4[%c0_10, %c0_11] : memref<128x128xbf16, #tpu.memory_space<vmem>>, vector<128x128xbf16>
    %cst_12 = arith.constant dense<0.000000e+00> : vector<128x128xf32>
    %15 = tpu.matmul %12, %14, %cst_12 {dimension_numbers = #tpu.dot_dimension_numbers<[1], [0], [0], [1], [0, 0, 1, 1], [], []>} : vector<128x128xbf16>, vector<128x128xbf16>, vector<128x128xf32> -> vector<128x128xf32>
    %c0_13 = arith.constant 0 : index
    %c0_14 = arith.constant 0 : index
    %16 = vector.load %arg5[%c0_13, %c0_14] : memref<1x128xf32, #tpu.memory_space<vmem>>, vector<1x128xf32>
    %17 = vector.broadcast %16 : vector<1x128xf32> to vector<128x128xf32>
    %18 = arith.addf %15, %17 : vector<128x128xf32>
    %19 = math.tanh %18 : vector<128x128xf32>
    %cst_15 = arith.constant dense<0.000000e+00> : vector<128xf32>
    %20 = vector.multi_reduction <add>, %19, %cst_15 [0] : vector<128x128xf32> to vector<128xf32>
    %21 = vector.shape_cast %20 : vector<128xf32> to vector<1x128xf32>
    %c0_16 = arith.constant 0 : index
    %c0_17 = arith.constant 0 : index
    %c0_18 = arith.constant 0 : index
    %22 = vector.load %arg8[%c0_16, %c0_17, %c0_18] : memref<1x1x128xf32, #tpu.memory_space<vmem>>, vector<1x1x128xf32>
    %23 = vector.shape_cast %22 : vector<1x1x128xf32> to vector<1x128xf32>
    %24 = vector.shape_cast %21 : vector<1x128xf32> to vector<1x1x128xf32>
    tpu.vector_store %arg8[%c0_16, %c0_17, %c0_18], %24 {strides = array<i32>} : memref<1x1x128xf32, #tpu.memory_space<vmem>>, vector<1x1x128xf32>,
    return
  }
  func.func @transform_0(%arg0: i32) -> (i32, i32) {
    %c0_i32 = arith.constant 0 : i32
    %c0_i32_0 = arith.constant 0 : i32
    return %arg0, %c0_i32 : i32, i32
  }
  func.func @transform_1(%arg0: i32) -> (i32, i32) {
    %c0_i32 = arith.constant 0 : i32
    %c0_i32_0 = arith.constant 0 : i32
    %c0_i32_1 = arith.constant 0 : i32
    return %c0_i32, %c0_i32_0 : i32, i32
  }
  func.func @transform_2(%arg0: i32) -> (i32, i32) {
    %c0_i32 = arith.constant 0 : i32
    %c0_i32_0 = arith.constant 0 : i32
    %c0_i32_1 = arith.constant 0 : i32
    return %c0_i32, %c0_i32_0 : i32, i32
  }
  func.func @transform_3(%arg0: i32) -> (i32, i32) {
    %c0_i32 = arith.constant 0 : i32
    %c0_i32_0 = arith.constant 0 : i32
    %c0_i32_1 = arith.constant 0 : i32
    return %c0_i32, %c0_i32_0 : i32, i32
  }
  func.func @transform_4(%arg0: i32) -> (i32, i32) {
    %c0_i32 = arith.constant 0 : i32
    %c0_i32_0 = arith.constant 0 : i32
    %c0_i32_1 = arith.constant 0 : i32
    return %c0_i32, %c0_i32_0 : i32, i32
  }
  func.func @transform_5(%arg0: i32) -> (i32, i32) {
    %c0_i32 = arith.constant 0 : i32
    %c0_i32_0 = arith.constant 0 : i32
    %c0_i32_1 = arith.constant 0 : i32
    return %c0_i32, %c0_i32_0 : i32, i32
  }
  func.func @transform_6(%arg0: i32) -> (i32, i32) {
    %c0_i32 = arith.constant 0 : i32
    %c0_i32_0 = arith.constant 0 : i32
    return %arg0, %c0_i32 : i32, i32
  }
  func.func @transform_7(%arg0: i32) -> (i32, i32, i32) {
    %c0_i32 = arith.constant 0 : i32
    %c0_i32_0 = arith.constant 0 : i32
    %c0_i32_1 = arith.constant 0 : i32
    return %arg0, %c0_i32, %c0_i32_0 : i32, i32, i32
  }
}

module attributes {stable_mosaic.version = 11 : i64} {
  func.func @_attn_combine_kernel(%arg0: i32, %arg1: memref<2xf32, #tpu.memory_space<smem>>, %arg2: memref<128x128xbf16, #tpu.memory_space<vmem>>, %arg3: memref<128x128xbf16, #tpu.memory_space<vmem>>, %arg4: memref<128x64xf32, #tpu.memory_space<vmem>>) attributes {dimension_semantics = [#tpu.dimension_semantics<parallel>], iteration_bounds = array<i64: 2>, scalar_prefetch = 0 : i64, scratch_operands = 0 : i64, tpu.core_type = #tpu.core_type<tc>, window_params = [{transform_indices = @transform_0, window_bounds = array<i64: 2>}, {transform_indices = @transform_1, window_bounds = array<i64: 128, 128>}, {transform_indices = @transform_2, window_bounds = array<i64: 128, 128>}, {transform_indices = @transform_3, window_bounds = array<i64: 128, 64>}]} {
    %c0 = arith.constant 0 : index
    %0 = memref.load %arg1[%c0] : memref<2xf32, #tpu.memory_space<smem>>
    %c0_0 = arith.constant 0 : index
    %c0_1 = arith.constant 0 : index
    %1 = vector.load %arg2[%c0_0, %c0_1] : memref<128x128xbf16, #tpu.memory_space<vmem>>, vector<128x128xbf16>
    %2 = arith.extf %1 : vector<128x128xbf16> to vector<128x128xf32>
    %3 = vector.broadcast %0 : f32 to vector<128x128xf32>
    %4 = arith.mulf %3, %2 : vector<128x128xf32>
    %c1 = arith.constant 1 : index
    %5 = memref.load %arg1[%c1] : memref<2xf32, #tpu.memory_space<smem>>
    %c0_2 = arith.constant 0 : index
    %c0_3 = arith.constant 0 : index
    %6 = vector.load %arg3[%c0_2, %c0_3] : memref<128x128xbf16, #tpu.memory_space<vmem>>, vector<128x128xbf16>
    %7 = arith.extf %6 : vector<128x128xbf16> to vector<128x128xf32>
    %8 = vector.broadcast %5 : f32 to vector<128x128xf32>
    %9 = arith.mulf %8, %7 : vector<128x128xf32>
    %10 = arith.addf %4, %9 : vector<128x128xf32>
    %11 = vector.extract_strided_slice %10 {offsets = [0, 0], sizes = [128, 64], strides = [1, 1]} : vector<128x128xf32> to vector<128x64xf32>
    %c0_4 = arith.constant 0 : index
    %c0_5 = arith.constant 0 : index
    %12 = vector.load %arg4[%c0_4, %c0_5] : memref<128x64xf32, #tpu.memory_space<vmem>>, vector<128x64xf32>
    tpu.vector_store %arg4[%c0_4, %c0_5], %11 {strides = array<i32>} : memref<128x64xf32, #tpu.memory_space<vmem>>, vector<128x64xf32>,
    return
  }
  func.func @transform_0(%arg0: i32) -> i32 {
    %c0_i32 = arith.constant 0 : i32
    %c0_i32_0 = arith.constant 0 : i32
    return %c0_i32 : i32
  }
  func.func @transform_1(%arg0: i32) -> (i32, i32) {
    %c0_i32 = arith.constant 0 : i32
    %c0_i32_0 = arith.constant 0 : i32
    return %arg0, %c0_i32 : i32, i32
  }
  func.func @transform_2(%arg0: i32) -> (i32, i32) {
    %c0_i32 = arith.constant 0 : i32
    %c0_i32_0 = arith.constant 0 : i32
    return %arg0, %c0_i32 : i32, i32
  }
  func.func @transform_3(%arg0: i32) -> (i32, i32) {
    %c0_i32 = arith.constant 0 : i32
    %c0_i32_0 = arith.constant 0 : i32
    return %arg0, %c0_i32 : i32, i32
  }
}

</mosaic_0001>

<bundles_post_ra>
// kernel: mp_encoder_forward.13
= control target key start
LH: loop header
LB: loop body
LE: loop exit
PB: predicated region body
PF: predicated region fallthrough
CT: control target
= control target key end

     0   :  { %9 = vsyncpa [#allocation3], 0  ;;  %s688_s15 = smov 0   ;;  %s818_s0 = inlined_call_operand.vmem [shape: f32[3], index: 0, kind: input, shape index: {}]   ;;  %s819_s1 = inlined_call_operand.vmem [shape: bf16[208,128], index: 1, kind: input, shape index: {}]   ;;  %s820_s2 = inlined_call_operand.vmem [shape: bf16[208,128], index: 2, kind: input, shape index: {}]   ;;  %s821_s3 = inlined_call_operand.vmem [shape: bf16[208,128], index: 3, kind: input, shape index: {}]   ;;  %s822_s4 = inlined_call_operand.vmem [shape: f32[208,64], index: 4, kind: output, shape index: {}]  }
   0x1 LB: > { %s514_s16 = sadd.s32 4294967295, %s660_s15   ;;  %p516_p0 = scmp.ge.s32.totalorder %s660_s15, 1  ;;  %s660_s15 = sphi %s688_s15, %s15_s15  }
   0x2   : > { %p145_p1 = scmp.lt.s32.totalorder %s660_s15, 3  ;;  %s157_s19 = sshll.u32 %s818_s0, 4  ;;  %s158_s19 = int_to_ptr.vmem [resolvable:$true] %s157_s19 }
   0x3   : > { %p624_p3 = scmp.eq.s32.totalorder %s514_s16, 0  ;;  %s662_s20 = smov [#allocation2]  }
   0x4   : > { %p146_p2 = pnand %p516_p0, %p145_p1 }
   0x6   : > { %p620_p4 = pneg %p146_p2  ;;  %197 = sbr.rel (%p146_p2) target bundleno = 54 (0x36), region = 36 }
   0x8   : > { %p621_p5 = pnand %p624_p3, %p620_p4 }
   0xa   : > { %623 = dma.vmem_to_smem (!%p621_p5), %s158_s19, 16, %s662_s20, [#allocation3]  }
   0xb   : > { %655 = dma.done.wait (%p624_p3), [#allocation3], 16  }
   0xc   : > { %657 = vsyncadd (%p624_p3), [#allocation3], 4294967280 }
   0xd   : > { %204 = sfence }
   0xe   : > { %s235_s21 = smul.u32 13, %s514_s16  ;;  %s259_s22 = sld [smem:[#allocation2]]  ;;  %vm408_vm0 = vcmask 523264  }
   0xf   : > { %s525_s23 = sld [smem:[#allocation2 + $0x1]] }
  0x10   : > { %p236_p6 = scmp.lt.s32.totalorder %s235_s21, 25  ;;  %s526_s24 = sld [smem:[#allocation2 + $0x2]] }
  0x12   : > { %s824_s21 = smov (!%p236_p6, %s235_s21), 25 }
  0x13   : > { %s521_s25 = sshll.u32 %s824_s21, 2  ;;  %s524_s9 = sshll.u32 %s824_s21, 3 }
  0x14   : > { %s705_s28 = scalar_lea.vmem %s819_s1, %s521_s25  ;;  %s710_s5 = scalar_lea.vmem %s820_s2, %s521_s25  ;;  %v712_v0 = vstv %s259_s22 }
  0x15   : > { %v714_v1 = vstv %s525_s23  ;;  %s719_s8 = scalar_lea.vmem %s821_s3, %s521_s25  ;;  %v530_v2 = vld [vmem:[%s705_s28] sm:$0xff]   ;;  %v601_v5 = vld [vmem:[%s705_s28 + $0x8] sm:$0xff]   ;;  %v602_v21 = vld [vmem:[%s705_s28 + $0x10] sm:$0xff]   ;;  %s743_s12 = scalar_lea.vmem %s822_s4, %s524_s9 }
  0x16   : > { %v554_v3 = vld [vmem:[%s710_s5] sm:$0xff]   ;;  %v723_v4 = vstv %s526_s24  ;;  %v531_v6 = vunpack.c.l.bf16 %v530_v2  ;;  %v532_v9 = vunpack.c.h.bf16 %v530_v2  ;;  %v606_v11 = vld [vmem:[%s710_s5 + $0x8] sm:$0xff]   ;;  %v535_v14 = vunpack.c.l.bf16 %v601_v5  ;;  %v607_v30 = vld [vmem:[%s710_s5 + $0x10] sm:$0xff]  }
  0x17   : > { %v555_v7 = vunpack.c.l.bf16 %v554_v3  ;;  %v578_v8 = vld [vmem:[%s719_s8] sm:$0xff]   ;;  %v556_v10 = vunpack.c.h.bf16 %v554_v3  ;;  %v559_v15 = vunpack.c.l.bf16 %v606_v11  ;;  %v611_v16 = vld [vmem:[%s719_s8 + $0x8] sm:$0xff]   ;;  %v536_v29 = vunpack.c.h.bf16 %v601_v5  ;;  %v612_v35 = vld [vmem:[%s719_s8 + $0x10] sm:$0xff]  }
  0x18   : > { %v579_v12 = vunpack.c.l.bf16 %v578_v8  ;;  %v580_v13 = vunpack.c.h.bf16 %v578_v8  ;;  %v287_v17 = vmul.f32 %v531_v6, %v712_v0  ;;  %v288_v19 = vmul.f32 %v532_v9, %v712_v0  ;;  %v603_v40 = vld [vmem:[%s705_s28 + $0x18] sm:$0xff]   ;;  %v604_v59 = vld [vmem:[%s705_s28 + $0x20] sm:$0xff]  }
  0x19   : > { %v328_v18 = vmul.f32 %v555_v7, %v714_v1  ;;  %v329_v20 = vmul.f32 %v556_v10, %v714_v1  ;;  %v289_v24 = vmul.f32 %v535_v14, %v712_v0  ;;  %v330_v25 = vmul.f32 %v559_v15, %v714_v1  ;;  %v608_v45 = vld [vmem:[%s710_s5 + $0x18] sm:$0xff]   ;;  %v609_v7 = vld [vmem:[%s710_s5 + $0x20] sm:$0xff]  }
  0x1a   : > { %v382_v22 = vmul.f32 %v579_v12, %v723_v4  ;;  %v383_v23 = vmul.f32 %v580_v13, %v723_v4  ;;  %v583_v28 = vunpack.c.l.bf16 %v611_v16  ;;  %v560_v32 = vunpack.c.h.bf16 %v606_v11  ;;  %v613_v54 = vld [vmem:[%s719_s8 + $0x18] sm:$0xff]   ;;  %v614_v12 = vld [vmem:[%s719_s8 + $0x20] sm:$0xff]  }
  0x1b   : > { %v341_v26 = vadd.f32 %v328_v18, %v287_v17  ;;  %v342_v27 = vadd.f32 %v329_v20, %v288_v19  ;;  %v343_v31 = vadd.f32 %v330_v25, %v289_v24  ;;  %v584_v33 = vunpack.c.h.bf16 %v611_v16  ;;  %v605_v17 = vld [vmem:[%s705_s28 + $0x28] sm:$0xff]  }
  0x1c   : > { %v539_v34 = vunpack.c.l.bf16 %v602_v21  ;;  %v384_v38 = vmul.f32 %v583_v28, %v723_v4  ;;  %v290_v39 = vmul.f32 %v536_v29, %v712_v0  ;;  %v331_v41 = vmul.f32 %v560_v32, %v714_v1 }
  0x1d   : > { %v395_v36 = vadd.f32 %v382_v22, %v341_v26  ;;  %v396_v37 = vadd.f32 %v383_v23, %v342_v27  ;;  %v385_v42 = vmul.f32 %v584_v33, %v723_v4  ;;  %v563_v44 = vunpack.c.l.bf16 %v607_v30  ;;  %v610_v22 = vld [vmem:[%s710_s5 + $0x28] sm:$0xff]  }
  0x1e   : > { %v291_v43 = vmul.f32 %v539_v34, %v712_v0  ;;  %v397_v46 = vadd.f32 %v384_v38, %v343_v31  ;;  %v587_v47 = vunpack.c.l.bf16 %v612_v35  ;;  %v540_v48 = vunpack.c.h.bf16 %v602_v21  ;;  %v615_v31 = vld [vmem:[%s719_s8 + $0x28] sm:$0xff]  }
  0x1f   : > { %409 = vst.msk [vmem:[%s743_s12] sm:$0xff] %vm408_vm0, %v395_v36  ;;  %v564_v49 = vunpack.c.h.bf16 %v607_v30  ;;  %v344_v50 = vadd.f32 %v331_v41, %v290_v39  ;;  %v332_v51 = vmul.f32 %v563_v44, %v714_v1  ;;  %v588_v52 = vunpack.c.h.bf16 %v612_v35  ;;  %v272_v36 = vld [vmem:[%s705_s28 + $0x30] sm:$0xf] }
  0x20   : > { %410 = vst.msk [vmem:[%s743_s12 + $0x8] sm:$0xff] %vm408_vm0, %v396_v37  ;;  %v543_v53 = vunpack.c.l.bf16 %v603_v40  ;;  %v386_v55 = vmul.f32 %v587_v47, %v723_v4  ;;  %v292_v56 = vmul.f32 %v540_v48, %v712_v0  ;;  %v567_v58 = vunpack.c.l.bf16 %v608_v45 }
  0x21   : > { %411 = vst.msk [vmem:[%s743_s12 + $0x10] sm:$0xff] %vm408_vm0, %v397_v46  ;;  %v333_v57 = vmul.f32 %v564_v49, %v714_v1  ;;  %v398_v60 = vadd.f32 %v385_v42, %v344_v50  ;;  %v345_v61 = vadd.f32 %v332_v51, %v291_v43  ;;  %v387_v62 = vmul.f32 %v588_v52, %v723_v4  ;;  %v367_v50 = vld [vmem:[%s719_s8 + $0x30] sm:$0xf] }
  0x22   : > { %v293_v63 = vmul.f32 %v543_v53, %v712_v0  ;;  %v334_v3 = vmul.f32 %v567_v58, %v714_v1  ;;  %v591_v5 = vunpack.c.l.bf16 %v613_v54  ;;  %v544_v6 = vunpack.c.h.bf16 %v603_v40 }
  0x23   : > { %v346_v2 = vadd.f32 %v333_v57, %v292_v56  ;;  %412 = vst.msk [vmem:[%s743_s12 + $0x18] sm:$0xff] %vm408_vm0, %v398_v60  ;;  %v399_v8 = vadd.f32 %v386_v55, %v345_v61  ;;  %v568_v9 = vunpack.c.h.bf16 %v608_v45  ;;  %v592_v10 = vunpack.c.h.bf16 %v613_v54  ;;  %v313_v45 = vld [vmem:[%s710_s5 + $0x30] sm:$0xf] }
  0x24   : > { %v547_v11 = vunpack.c.l.bf16 %v604_v59  ;;  %v347_v14 = vadd.f32 %v334_v3, %v293_v63  ;;  %v388_v15 = vmul.f32 %v591_v5, %v723_v4  ;;  %v294_v16 = vmul.f32 %v544_v6, %v712_v0 }
  0x25   : > { %v400_v13 = vadd.f32 %v387_v62, %v346_v2  ;;  %413 = vst.msk [vmem:[%s743_s12 + $0x20] sm:$0xff] %vm408_vm0, %v399_v8  ;;  %v335_v18 = vmul.f32 %v568_v9, %v714_v1  ;;  %v389_v19 = vmul.f32 %v592_v10, %v723_v4  ;;  %v571_v21 = vunpack.c.l.bf16 %v609_v7 }
  0x26   : > { %v295_v20 = vmul.f32 %v547_v11, %v712_v0  ;;  %v401_v23 = vadd.f32 %v388_v15, %v347_v14  ;;  %v595_v24 = vunpack.c.l.bf16 %v614_v12  ;;  %v548_v25 = vunpack.c.h.bf16 %v604_v59 }
  0x27   : > { %414 = vst.msk [vmem:[%s743_s12 + $0x28] sm:$0xff] %vm408_vm0, %v400_v13  ;;  %v572_v26 = vunpack.c.h.bf16 %v609_v7  ;;  %v348_v27 = vadd.f32 %v335_v18, %v294_v16  ;;  %v336_v28 = vmul.f32 %v571_v21, %v714_v1  ;;  %v596_v29 = vunpack.c.h.bf16 %v614_v12 }
  0x28   : > { %v551_v30 = vunpack.c.l.bf16 %v605_v17  ;;  %415 = vst.msk [vmem:[%s743_s12 + $0x30] sm:$0xff] %vm408_vm0, %v401_v23  ;;  %v390_v32 = vmul.f32 %v595_v24, %v723_v4  ;;  %v296_v33 = vmul.f32 %v548_v25, %v712_v0  ;;  %v575_v35 = vunpack.c.l.bf16 %v610_v22 }
  0x29   : > { %v337_v34 = vmul.f32 %v572_v26, %v714_v1  ;;  %v402_v37 = vadd.f32 %v389_v19, %v348_v27  ;;  %v349_v38 = vadd.f32 %v336_v28, %v295_v20  ;;  %v391_v39 = vmul.f32 %v596_v29, %v723_v4 }
  0x2a   : > { %v297_v40 = vmul.f32 %v551_v30, %v712_v0  ;;  %v338_v42 = vmul.f32 %v575_v35, %v714_v1  ;;  %v599_v43 = vunpack.c.l.bf16 %v615_v31  ;;  %v552_v44 = vunpack.c.h.bf16 %v605_v17 }
  0x2b   : > { %v350_v41 = vadd.f32 %v337_v34, %v296_v33  ;;  %416 = vst.msk [vmem:[%s743_s12 + $0x38] sm:$0xff] %vm408_vm0, %v402_v37  ;;  %v403_v46 = vadd.f32 %v390_v32, %v349_v38  ;;  %v576_v47 = vunpack.c.h.bf16 %v610_v22  ;;  %v600_v48 = vunpack.c.h.bf16 %v615_v31 }
  0x2c   : > { %v285_v49 = vunpack.c.l.bf16 %v272_v36  ;;  %v351_v52 = vadd.f32 %v338_v42, %v297_v40  ;;  %v392_v53 = vmul.f32 %v599_v43, %v723_v4  ;;  %v298_v54 = vmul.f32 %v552_v44, %v712_v0 }
  0x2d   : > { %v404_v51 = vadd.f32 %v391_v39, %v350_v41  ;;  %417 = vst.msk [vmem:[%s743_s12 + $0x40] sm:$0xff] %vm408_vm0, %v403_v46  ;;  %v339_v55 = vmul.f32 %v576_v47, %v714_v1  ;;  %v393_v56 = vmul.f32 %v600_v48, %v723_v4  ;;  %v326_v58 = vunpack.c.l.bf16 %v313_v45 }
  0x2e   : > { %v299_v57 = vmul.f32 %v712_v0, %v285_v49  ;;  %v405_v59 = vadd.f32 %v392_v53, %v351_v52  ;;  %v380_v60 = vunpack.c.l.bf16 %v367_v50 }
  0x2f   : > { %418 = vst.msk [vmem:[%s743_s12 + $0x48] sm:$0xff] %vm408_vm0, %v404_v51  ;;  %v352_v61 = vadd.f32 %v339_v55, %v298_v54  ;;  %v340_v62 = vmul.f32 %v714_v1, %v326_v58 }
  0x30   : > { %419 = vst.msk [vmem:[%s743_s12 + $0x50] sm:$0xff] %vm408_vm0, %v405_v59  ;;  %v394_v63 = vmul.f32 %v723_v4, %v380_v60 }
  0x31   : > { %v406_v2 = vadd.f32 %v393_v56, %v352_v61  ;;  %v353_v3 = vadd.f32 %v340_v62, %v299_v57 }
  0x33   : > { %420 = vst.msk [vmem:[%s743_s12 + $0x58] sm:$0xff] %vm408_vm0, %v406_v2  ;;  %v407_v5 = vadd.f32 %v394_v63, %v353_v3 }
  0x35   : > { %421 = vst.msk [vmem:[%s743_s12 + $0x60] sm:$0xff] %vm408_vm0, %v407_v5 }
  0x36 PF: > { %s15_s15 = sadd.s32 1, %s660_s15  }
  0x37   : > { %p12_p7 = scmp.ge.s32.totalorder %s15_s15, 4  }
  0x39   :  { %14 = sbr.rel (!%p12_p7) target bundleno = 1 (0x1), region = 77 }
  0x3e   :  { %444 = vsyncpa [#allocation3], 1 }
  0x3f   :  { %446 = vsyncpa [#allocation3 + $0x1], 1 }

// kernel: mp_encoder_forward.10
= control target key start
LH: loop header
LB: loop body
LE: loop exit
PB: predicated region body
PF: predicated region fallthrough
CT: control target
= control target key end

     0   :  { %s1287_s26 = smov 0   ;;  %s1504_s0 = inlined_call_operand.vmem [shape: bf16[208,200], index: 0, kind: input, shape index: {}]   ;;  %s1505_s1 = inlined_call_operand.vmem [shape: bf16[200,128], index: 1, kind: input, shape index: {}]   ;;  %s1506_s2 = inlined_call_operand.vmem [shape: f32[1,128], index: 2, kind: input, shape index: {}]   ;;  %s1507_s3 = inlined_call_operand.vmem [shape: bf16[128,128], index: 3, kind: input, shape index: {}]   ;;  %s1508_s4 = inlined_call_operand.vmem [shape: f32[1,128], index: 4, kind: input, shape index: {}]   ;;  %s1509_s5 = inlined_call_operand.<no memory space> [shape: f32[1,1], index: 5, kind: input, shape index: {}]   ;;  %s1510_s6 = inlined_call_operand.vmem [shape: bf16[208,128], index: 6, kind: output, shape index: {0}]   ;;  %s1511_s7 = inlined_call_operand.vmem [shape: f32[2,1,128], index: 7, kind: output, shape index: {1}]  }
   0x1   :  { %13 = sst [smem:[#allocation2]] %s1509_s5 }
   0x2 LB: > { %s1293_s27 = sadd.s32 4294967295, %s1242_s26   ;;  %p975_p0 = scmp.ge.s32.totalorder %s1242_s26, 1  ;;  %s1242_s26 = sphi %s1287_s26, %s19_s26  }
   0x3   : > { %p243_p1 = scmp.lt.s32.totalorder %s1242_s26, 3 }
   0x5   : > { %p244_p2 = pnand %p975_p0, %p243_p1 }
   0x6   : > { %s279_s8 = smul.u32 (!%p244_p2), 13, %s1293_s27  ;;  %s585_s9 = sld [smem:[#allocation2]] (!%p244_p2) }
   0x7   : > { %247 = sbr.rel (%p244_p2) target bundleno = 435 (0x1b3), region = 44  ;;  %p292_p4 = scmp.lt.s32.totalorder (!%p244_p2), %s1293_s27, 1 }
   0x8   : > { %p280_p3 = scmp.lt.s32.totalorder (!%p244_p2), %s279_s8, 25  ;;  %s816_s17 = smul.u32 (!%p244_p2), 104, %s1293_s27 }
   0xc   : > { %v1136_v0 = vld [vmem:[%s1505_s1 + $0x38] sm:$0xff]  ;;  %v333_v1 = vld [vmem:[%s1505_s1 + $0x60] sm:$0xf]  ;;  %vm495_vm0 = vcmask 1043456   ;;  %v1135_v3 = vld [vmem:[%s1505_s1 + $0x30] sm:$0xff]  ;;  %s1513_s8 = smov (!%p280_p3, %s279_s8), 25 }
   0xd   : > { %v447_v2 = vunpack.c.l.b16 %v333_v1  ;;  %499 = vmatpush.bf16.msra.mxu0 %v1136_v0  ;;  %1184 = vmatpush.bf16.msra.mxu3 %v1136_v0  ;;  %v1140_v6 = vld [vmem:[%s1505_s1 + $0x58] sm:$0xff]  ;;  %v1134_v7 = vld [vmem:[%s1505_s1 + $0x28] sm:$0xff]  ;;  %v1139_v8 = vld [vmem:[%s1505_s1 + $0x50] sm:$0xff]  ;;  %s1116_s19 = sshll.u32 %s1513_s8, 3  ;;  %vm473_vm1 = vcmask 588800   ;;  %s978_s12 = sshll.u32 %s1513_s8, 2 }
   0xe   : > { %v1133_v9 = vld [vmem:[%s1505_s1 + $0x20] sm:$0xff]  ;;  %v1138_v10 = vld [vmem:[%s1505_s1 + $0x48] sm:$0xff]  ;;  %v1132_v11 = vld [vmem:[%s1505_s1 + $0x18] sm:$0xff]  ;;  %s1331_s28 = scalar_lea.vmem %s1504_s0, %s1116_s19  ;;  %s1418_s15 = scalar_lea.vmem %s1510_s6, %s978_s12 }
   0xf   : > { %v460_v4 = vpack.c.b16 %v447_v2, %v447_v2  ;;  %v1137_v12 = vld [vmem:[%s1505_s1 + $0x40] sm:$0xff]  ;;  %v1131_v13 = vld [vmem:[%s1505_s1 + $0x10] sm:$0xff]  ;;  %v983_v15 = vld [vmem:[%s1331_s28 + $0x8] sm:$0xf0]  ;;  %s1515_s27 = smov (!%p292_p4, %s1293_s27), 1 }
  0x10   : > { %v1117_v14 = vld [vmem:[%s1331_s28 + $0x4] sm:$0xf]  ;;  %v1130_v17 = vld [vmem:[%s1505_s1 + $0x8] sm:$0xff]  ;;  %v981_v19 = vld [vmem:[%s1331_s28] sm:$0xf]  ;;  %s294_s20 = scalar_lea.vmem %s1511_s7, %s1515_s27 }
  0x11   : > { %v497_v5 = vsel %vm495_vm0, %v460_v4, 0  ;;  %500 = vmatpush.bf16.msra.mxu0 %v1135_v3  ;;  %1185 = vmatpush.bf16.msra.mxu3 %v1135_v3  ;;  %v986_v16 = vor.u32 %v1117_v14, %v983_v15  ;;  %v1129_v18 = vld [vmem:[%s1505_s1] sm:$0xff]  ;;  %v1118_v20 = vld [vmem:[%s1331_s28 + $0x4] sm:$0xf0]  ;;  %v989_v21 = vld [vmem:[%s1331_s28 + $0x10] sm:$0xf] }
  0x12   : > { %545 = vmatpush.bf16.msra.mxu1 %v497_v5  ;;  %v1120_v22 = vld [vmem:[%s1331_s28 + $0x14] sm:$0xf0]  ;;  %v982_v23 = vor.u32 %v1118_v20, %v981_v19  ;;  %v1119_v25 = vld [vmem:[%s1331_s28 + $0x14] sm:$0xf]  ;;  %v991_v26 = vld [vmem:[%s1331_s28 + $0x18] sm:$0xf0] }
  0x13   : > { %v990_v24 = vor.u32 %v1120_v22, %v989_v21  ;;  %v994_v27 = vor.u32 %v1119_v25, %v991_v26  ;;  %v997_v28 = vld [vmem:[%s1331_s28 + $0x20] sm:$0xf]  ;;  %v1122_v29 = vld [vmem:[%s1331_s28 + $0x24] sm:$0xf0]  ;;  %v1121_v31 = vld [vmem:[%s1331_s28 + $0x24] sm:$0xf] }
  0x14   : > { %v998_v30 = vor.u32 %v1122_v29, %v997_v28  ;;  %v999_v32 = vld [vmem:[%s1331_s28 + $0x28] sm:$0xf0]  ;;  %v1005_v34 = vld [vmem:[%s1331_s28 + $0x30] sm:$0xf]  ;;  %v1124_v35 = vld [vmem:[%s1331_s28 + $0x34] sm:$0xf0] }
  0x15   : > { %501 = vmatpush.bf16.msra.mxu0 %v1134_v7  ;;  %1186 = vmatpush.bf16.msra.mxu3 %v1134_v7  ;;  %v1002_v33 = vor.u32 %v1121_v31, %v999_v32  ;;  %v1006_v36 = vor.u32 %v1124_v35, %v1005_v34  ;;  %v1123_v37 = vld [vmem:[%s1331_s28 + $0x34] sm:$0xf]  ;;  %v1007_v38 = vld [vmem:[%s1331_s28 + $0x38] sm:$0xf0]  ;;  %v1013_v40 = vld [vmem:[%s1331_s28 + $0x40] sm:$0xf]  ;;  %v1407_v7 = vstv %s585_s9 }
  0x16   : > { %546 = vmatpush.bf16.msra.mxu1 %v1140_v6  ;;  %v1010_v39 = vor.u32 %v1123_v37, %v1007_v38  ;;  %v1126_v41 = vld [vmem:[%s1331_s28 + $0x44] sm:$0xf0]  ;;  %v1125_v43 = vld [vmem:[%s1331_s28 + $0x44] sm:$0xf]  ;;  %v1015_v44 = vld [vmem:[%s1331_s28 + $0x48] sm:$0xf0] }
  0x17   : > { %v1014_v42 = vor.u32 %v1126_v41, %v1013_v40  ;;  %v1018_v45 = vor.u32 %v1125_v43, %v1015_v44  ;;  %v1021_v46 = vld [vmem:[%s1331_s28 + $0x50] sm:$0xf]  ;;  %v1128_v47 = vld [vmem:[%s1331_s28 + $0x54] sm:$0xf0]  ;;  %v1127_v49 = vld [vmem:[%s1331_s28 + $0x54] sm:$0xf] }
  0x18   : > { %v1022_v48 = vor.u32 %v1128_v47, %v1021_v46  ;;  %v1023_v50 = vld [vmem:[%s1331_s28 + $0x58] sm:$0xf0]  ;;  %v308_v52 = vld [vmem:[%s1331_s28 + $0x60] sm:$0xff]  ;;  %v1147_v58 = vld [vmem:[%s1507_s3 + $0x30] sm:$0xff] }
  0x19   : > { %502 = vmatpush.bf16.msra.mxu0 %v1133_v9  ;;  %1187 = vmatpush.bf16.msra.mxu3 %v1133_v9  ;;  %v1026_v51 = vor.u32 %v1127_v49, %v1023_v50  ;;  %v375_v53 = vunpack.c.l.b16 %v308_v52  ;;  %v376_v55 = vunpack.c.h.b16 %v308_v52  ;;  %v1148_v56 = vld [vmem:[%s1507_s3 + $0x38] sm:$0xff]  ;;  %v1146_v59 = vld [vmem:[%s1507_s3 + $0x28] sm:$0xff]  ;;  %v1145_v60 = vld [vmem:[%s1507_s3 + $0x20] sm:$0xff] }
  0x1a   : > { %547 = vmatpush.bf16.msra.mxu1 %v1139_v8  ;;  %1192 = vmatpush.bf16.msra.mxu2 %v1148_v56  ;;  %v1144_v61 = vld [vmem:[%s1507_s3 + $0x18] sm:$0xff]  ;;  %v1143_v62 = vld [vmem:[%s1507_s3 + $0x10] sm:$0xff]  ;;  %v1142_v63 = vld [vmem:[%s1507_s3 + $0x8] sm:$0xff] }
  0x1b   : > { %v389_v54 = vpack.c.b16 %v375_v53, %v375_v53  ;;  %v390_v57 = vpack.c.b16 %v376_v55, %v376_v55  ;;  %v1141_v0 = vld [vmem:[%s1507_s3] sm:$0xff] }
  0x1c   : > { %v1404_v2 = vld [vmem:[%s1506_s2] ss:$0 sm:$0xff] }
  0x1d   : > { %503 = vmatpush.bf16.msra.mxu0 %v1132_v11  ;;  %1188 = vmatpush.bf16.msra.mxu3 %v1132_v11 }
  0x1e   : > { %548 = vmatpush.bf16.msra.mxu1 %v1138_v10  ;;  %1193 = vmatpush.bf16.msra.mxu2 %v1147_v58 }
  0x21   : > { %504 = vmatpush.bf16.msra.mxu0 %v1131_v13  ;;  %1189 = vmatpush.bf16.msra.mxu3 %v1131_v13 }
  0x22   : > { %549 = vmatpush.bf16.msra.mxu1 %v1137_v12  ;;  %1194 = vmatpush.bf16.msra.mxu2 %v1146_v59 }
  0x25   : > { %1075 = vmatmul.msk.bf16.vlgmr.msra.gmra.mxu1 %vm473_vm1, %v986_v16  ;;  %505 = vmatpush.bf16.msra.mxu0 %v1130_v17 }
  0x26   : > { %1190 = vmatpush.bf16.msra.mxu3 %v1130_v17  ;;  %1195 = vmatpush.bf16.msra.mxu2 %v1145_v60 }
  0x29   : > { %506 = vmatpush.bf16.msra.mxu0 %v1129_v18 }
  0x2a   : > { %1191 = vmatpush.bf16.msra.mxu3 %v1129_v18  ;;  %1196 = vmatpush.bf16.msra.mxu2 %v1144_v61 }
  0x2c   : > { %507 = vmatmul.bf16.vlgmr.msra.gmra.mxu0 %v982_v23 }
  0x2d   : > { %512 = vmatmul.bf16.vlgmr.msra.gmra.mxu3 %v990_v24  ;;  %760 = vmatpush.bf16.msrb.mxu0 %v1148_v56 }
  0x2e   : > { %1197 = vmatpush.bf16.msra.mxu2 %v1143_v62 }
  0x31   : > { %761 = vmatpush.bf16.msrb.mxu0 %v1147_v58 }
  0x32   : > { %1198 = vmatpush.bf16.msra.mxu2 %v1142_v63 }
  0x35   : > { %1076 = vmatmul.msk.bf16.gmra.mxu1 %vm473_vm1, %v994_v27  ;;  %762 = vmatpush.bf16.msrb.mxu0 %v1146_v59 }
  0x36   : > { %1199 = vmatpush.bf16.msra.mxu2 %v1141_v0 }
  0x39   : > { %763 = vmatpush.bf16.msrb.mxu0 %v1145_v60 }
  0x3d   : > { %517 = vmatmul.bf16.gmra.mxu3 %v998_v30  ;;  %764 = vmatpush.bf16.msrb.mxu0 %v1144_v61 }
  0x41   : > { %765 = vmatpush.bf16.msrb.mxu0 %v1143_v62 }
  0x45   : > { %1077 = vmatmul.msk.bf16.gmra.mxu1 %vm473_vm1, %v1002_v33  ;;  %766 = vmatpush.bf16.msrb.mxu0 %v1142_v63 }
  0x49   : > { %767 = vmatpush.bf16.msrb.mxu0 %v1141_v0 }
  0x4d   : > { %522 = vmatmul.bf16.gmra.mxu3 %v1006_v36 }
  0x55   : > { %1078 = vmatmul.msk.bf16.gmra.mxu1 %vm473_vm1, %v1010_v39 }
  0x5d   : > { %527 = vmatmul.bf16.gmra.mxu3 %v1014_v42 }
  0x65   : > { %1079 = vmatmul.msk.bf16.gmra.mxu1 %vm473_vm1, %v1018_v45 }
  0x6d   : > { %532 = vmatmul.bf16.gmra.mxu3 %v1022_v48 }
  0x75   : > { %1080 = vmatmul.msk.bf16.gmra.mxu1 %vm473_vm1, %v1026_v51 }
  0x7d   : > { %537 = vmatmul.bf16.gmra.mxu3 %v389_v54 }
  0x85   : > { %1081 = vmatmul.msk.bf16.gmra.mxu1 %vm473_vm1, %v390_v57 }
  0xa2   : > { %v551_v1 = vpop.f32.mrf.mxu1 }
  0xa9   : > { %v508_v4 = vpop.f32.mrf.mxu0 }
  0xaa   : > { %v553_v3 = vpop.f32.mrf.mxu1  ;;  %v509_v5 = vadd.f32 %v1404_v2, %v508_v4 }
  0xac   : > { %v552_v6 = vadd.f32 %v551_v1, %v509_v5 }
  0xae   : > { %v600_v8 = vmul.f32 %v1407_v7, %v552_v6  ;;  %vm586_vm2 = vcmp.gt.f32.partialorder %v552_v6, 0.0 }
  0xb0   : > { %v513_v9 = vpop.f32.mrf.mxu3  ;;  %v613_v15 = vsel %vm586_vm2, %v552_v6, %v600_v8 }
  0xb1   : > { %v514_v10 = vadd.f32 %v1404_v2, %v513_v9  ;;  %v510_v12 = vpop.f32.mrf.mxu0  ;;  %v626_v19 = vpack.c.bf16 %v613_v15, %v613_v15 }
  0xb2   : > { %v556_v11 = vpop.f32.mrf.mxu1  ;;  %v511_v13 = vadd.f32 %v1404_v2, %v510_v12 }
  0xb3   : > { %v557_v14 = vadd.f32 %v556_v11, %v514_v10  ;;  %v685_v27 = vunpack.c.l.b16 %v626_v19 }
  0xb4   : > { %v554_v16 = vadd.f32 %v553_v3, %v511_v13 }
  0xb5   : > { %v602_v18 = vmul.f32 %v1407_v7, %v557_v14  ;;  %vm588_vm4 = vcmp.gt.f32.partialorder %v557_v14, 0.0 }
  0xb6   : > { %vm587_vm3 = vcmp.gt.f32.partialorder %v554_v16, 0.0  ;;  %v601_v17 = vmul.f32 %v1407_v7, %v554_v16 }
  0xb7   : > { %v615_v29 = vsel %vm588_vm4, %v557_v14, %v602_v18 }
  0xb8   : > { %v614_v20 = vsel %vm587_vm3, %v554_v16, %v601_v17  ;;  %v515_v21 = vpop.f32.mrf.mxu3  ;;  %v628_v32 = vpack.c.bf16 %v615_v29, %v615_v29 }
  0xb9   : > { %v1152_v22 = vpack.c.bf16 %v614_v20, %v613_v15  ;;  %v516_v23 = vadd.f32 %v1404_v2, %v515_v21  ;;  %v627_v25 = vpack.c.bf16 %v614_v20, %v614_v20 }
  0xba   : > { %v558_v24 = vpop.f32.mrf.mxu1  ;;  %v687_v39 = vunpack.c.l.b16 %v628_v32 }
  0xbb   : > { %1153 = vst [vmem:[%s1418_s15] sm:$0xff] %v1152_v22   ;;  %v559_v26 = vadd.f32 %v558_v24, %v516_v23  ;;  %v686_v28 = vunpack.c.l.b16 %v627_v25 }
  0xbd   : > { %vm589_vm5 = vcmp.gt.f32.partialorder %v559_v26, 0.0  ;;  %v603_v30 = vmul.f32 %v1407_v7, %v559_v26  ;;  %v698_v31 = vpack.c.b16 %v686_v28, %v685_v27 }
  0xbf   : > { %768 = vmatmul.bf16.vlgmr.msrb.gmra.mxu0 %v698_v31  ;;  %v616_v33 = vsel %vm589_vm5, %v559_v26, %v603_v30 }
  0xc0   : > { %v518_v34 = vpop.f32.mrf.mxu3  ;;  %v629_v35 = vpack.c.bf16 %v616_v33, %v616_v33  ;;  %v1157_v36 = vpack.c.bf16 %v616_v33, %v615_v29 }
  0xc1   : > { %v519_v37 = vadd.f32 %v1404_v2, %v518_v34 }
  0xc2   : > { %v561_v38 = vpop.f32.mrf.mxu1  ;;  %1179 = vst [vmem:[%s1418_s15 + $0x8] sm:$0xff] %v1157_v36   ;;  %v688_v40 = vunpack.c.l.b16 %v629_v35 }
  0xc3   : > { %v562_v41 = vadd.f32 %v561_v38, %v519_v37 }
  0xc4   : > { %v699_v42 = vpack.c.b16 %v688_v40, %v687_v39 }
  0xc5   : > { %v604_v43 = vmul.f32 %v1407_v7, %v562_v41  ;;  %vm590_vm6 = vcmp.gt.f32.partialorder %v562_v41, 0.0 }
  0xc6   : > { %773 = vmatmul.bf16.vlgmr.msra.gmra.mxu2 %v699_v42 }
  0xc7   : > { %v617_v48 = vsel %vm590_vm6, %v562_v41, %v604_v43 }
  0xc8   : > { %v520_v44 = vpop.f32.mrf.mxu3  ;;  %v630_v50 = vpack.c.bf16 %v617_v48, %v617_v48 }
  0xc9   : > { %v521_v45 = vadd.f32 %v1404_v2, %v520_v44 }
  0xca   : > { %v563_v46 = vpop.f32.mrf.mxu1  ;;  %v689_v57 = vunpack.c.l.b16 %v630_v50 }
  0xcb   : > { %v564_v47 = vadd.f32 %v563_v46, %v521_v45 }
  0xcd   : > { %vm591_vm7 = vcmp.gt.f32.partialorder %v564_v47, 0.0  ;;  %v605_v49 = vmul.f32 %v1407_v7, %v564_v47 }
  0xcf   : > { %v618_v51 = vsel %vm591_vm7, %v564_v47, %v605_v49 }
  0xd0   : > { %v523_v52 = vpop.f32.mrf.mxu3  ;;  %v631_v53 = vpack.c.bf16 %v618_v51, %v618_v51  ;;  %v1162_v54 = vpack.c.bf16 %v618_v51, %v617_v48 }
  0xd1   : > { %v524_v55 = vadd.f32 %v1404_v2, %v523_v52 }
  0xd2   : > { %v566_v56 = vpop.f32.mrf.mxu1  ;;  %1180 = vst [vmem:[%s1418_s15 + $0x10] sm:$0xff] %v1162_v54   ;;  %v690_v58 = vunpack.c.l.b16 %v631_v53 }
  0xd3   : > { %v567_v59 = vadd.f32 %v566_v56, %v524_v55 }
  0xd4   : > { %v700_v60 = vpack.c.b16 %v690_v58, %v689_v57 }
  0xd5   : > { %v606_v61 = vmul.f32 %v1407_v7, %v567_v59  ;;  %vm592_vm8 = vcmp.gt.f32.partialorder %v567_v59, 0.0 }
  0xd6   : > { %778 = vmatmul.bf16.gmra.mxu2 %v700_v60 }
  0xd7   : > { %v619_v3 = vsel %vm592_vm8, %v567_v59, %v606_v61 }
  0xd8   : > { %v525_v62 = vpop.f32.mrf.mxu3  ;;  %v632_v5 = vpack.c.bf16 %v619_v3, %v619_v3 }
  0xd9   : > { %v526_v63 = vadd.f32 %v1404_v2, %v525_v62 }
  0xda   : > { %v568_v0 = vpop.f32.mrf.mxu1  ;;  %v691_v13 = vunpack.c.l.b16 %v632_v5 }
  0xdb   : > { %v569_v1 = vadd.f32 %v568_v0, %v526_v63 }
  0xdd   : > { %vm593_vm9 = vcmp.gt.f32.partialorder %v569_v1, 0.0  ;;  %v607_v4 = vmul.f32 %v1407_v7, %v569_v1 }
  0xdf   : > { %v620_v6 = vsel %vm593_vm9, %v569_v1, %v607_v4 }
  0xe0   : > { %v528_v8 = vpop.f32.mrf.mxu3  ;;  %v633_v9 = vpack.c.bf16 %v620_v6, %v620_v6  ;;  %v1167_v10 = vpack.c.bf16 %v620_v6, %v619_v3  ;;  %v817_v3 = vlaneseq }
  0xe1   : > { %v529_v11 = vadd.f32 %v1404_v2, %v528_v8 }
  0xe2   : > { %v571_v12 = vpop.f32.mrf.mxu1  ;;  %1181 = vst [vmem:[%s1418_s15 + $0x18] sm:$0xff] %v1167_v10   ;;  %v692_v14 = vunpack.c.l.b16 %v633_v9  ;;  %v1453_v6 = vshrl.u32 %v817_v3, 7 }
  0xe3   : > { %v572_v15 = vadd.f32 %v571_v12, %v529_v11  ;;  %v1459_v12 = vstv %s816_s17 }
  0xe4   : > { %v701_v16 = vpack.c.b16 %v692_v14, %v691_v13  ;;  %v819_v10 = vadd.s32 8, %v1453_v6  ;;  %v820_v13 = vadd.s32 16, %v1453_v6 }
  0xe5   : > { %v608_v17 = vmul.f32 %v1407_v7, %v572_v15  ;;  %vm594_vm10 = vcmp.gt.f32.partialorder %v572_v15, 0.0 }
  0xe6   : > { %783 = vmatmul.bf16.gmra.mxu2 %v701_v16  ;;  %v833_v16 = vadd.s32 %v1459_v12, %v819_v10 }
  0xe7   : > { %v621_v22 = vsel %vm594_vm10, %v572_v15, %v608_v17  ;;  %v821_v17 = vadd.s32 24, %v1453_v6 }
  0xe8   : > { %v530_v18 = vpop.f32.mrf.mxu3  ;;  %v634_v24 = vpack.c.bf16 %v621_v22, %v621_v22  ;;  %vm846_vm15 = vcmp.lt.s32.totalorder %v833_v16, 200 }
  0xe9   : > { %v531_v19 = vadd.f32 %v1404_v2, %v530_v18  ;;  %v832_v18 = vadd.s32 %v1459_v12, %v1453_v6 }
  0xea   : > { %v573_v20 = vpop.f32.mrf.mxu1  ;;  %v693_v31 = vunpack.c.l.b16 %v634_v24  ;;  %v835_v24 = vadd.s32 %v1459_v12, %v821_v17 }
  0xeb   : > { %v574_v21 = vadd.f32 %v573_v20, %v531_v19  ;;  %v834_v20 = vadd.s32 %v1459_v12, %v820_v13  ;;  %vm845_vm0 = vcmp.lt.s32.totalorder %v832_v18, 200 }
  0xec   : > { %vm848_vm2 = vcmp.lt.s32.totalorder %v835_v24, 200 }
  0xed   : > { %vm595_vm11 = vcmp.gt.f32.partialorder %v574_v21, 0.0  ;;  %v609_v23 = vmul.f32 %v1407_v7, %v574_v21  ;;  %vm847_vm1 = vcmp.lt.s32.totalorder %v834_v20, 200 }
  0xef   : > { %v622_v25 = vsel %vm595_vm11, %v574_v21, %v609_v23  ;;  %v822_v21 = vadd.s32 32, %v1453_v6 }
  0xf0   : > { %v533_v26 = vpop.f32.mrf.mxu3  ;;  %v635_v27 = vpack.c.bf16 %v622_v25, %v622_v25  ;;  %v1172_v28 = vpack.c.bf16 %v622_v25, %v621_v22 }
  0xf1   : > { %v534_v29 = vadd.f32 %v1404_v2, %v533_v26  ;;  %v823_v26 = vadd.s32 40, %v1453_v6 }
  0xf2   : > { %v576_v30 = vpop.f32.mrf.mxu1  ;;  %1182 = vst [vmem:[%s1418_s15 + $0x20] sm:$0xff] %v1172_v28   ;;  %v694_v32 = vunpack.c.l.b16 %v635_v27 }
  0xf3   : > { %v577_v33 = vadd.f32 %v576_v30, %v534_v29  ;;  %v836_v29 = vadd.s32 %v1459_v12, %v822_v21  ;;  %v824_v30 = vadd.s32 48, %v1453_v6 }
  0xf4   : > { %v702_v34 = vpack.c.b16 %v694_v32, %v693_v31 }
  0xf5   : > { %v610_v35 = vmul.f32 %v1407_v7, %v577_v33  ;;  %vm596_vm12 = vcmp.gt.f32.partialorder %v577_v33, 0.0  ;;  %vm849_vm3 = vcmp.lt.s32.totalorder %v836_v29, 200 }
  0xf6   : > { %788 = vmatmul.bf16.gmra.mxu2 %v702_v34 }
  0xf7   : > { %v623_v40 = vsel %vm596_vm12, %v577_v33, %v610_v35 }
  0xf8   : > { %v535_v36 = vpop.f32.mrf.mxu3  ;;  %v636_v42 = vpack.c.bf16 %v623_v40, %v623_v40 }
  0xf9   : > { %v536_v37 = vadd.f32 %v1404_v2, %v535_v36  ;;  %v825_v36 = vadd.s32 56, %v1453_v6 }
  0xfa   : > { %v578_v38 = vpop.f32.mrf.mxu1  ;;  %v695_v49 = vunpack.c.l.b16 %v636_v42 }
  0xfb   : > { %v579_v39 = vadd.f32 %v578_v38, %v536_v37  ;;  %v837_v38 = vadd.s32 %v1459_v12, %v823_v26 }
  0xfd   : > { %vm597_vm13 = vcmp.gt.f32.partialorder %v579_v39, 0.0  ;;  %v611_v41 = vmul.f32 %v1407_v7, %v579_v39  ;;  %vm850_vm4 = vcmp.lt.s32.totalorder %v837_v38, 200 }
  0xff   : > { %v624_v43 = vsel %vm597_vm13, %v579_v39, %v611_v41  ;;  %v838_v41 = vadd.s32 %v1459_v12, %v824_v30 }
 0x100   : > { %v538_v44 = vpop.f32.mrf.mxu3  ;;  %v637_v45 = vpack.c.bf16 %v624_v43, %v624_v43  ;;  %v1177_v46 = vpack.c.bf16 %v624_v43, %v623_v40 }
 0x101   : > { %v539_v47 = vadd.f32 %v1404_v2, %v538_v44  ;;  %v826_v44 = vadd.s32 64, %v1453_v6  ;;  %vm851_vm5 = vcmp.lt.s32.totalorder %v838_v41, 200 }
 0x102   : > { %v581_v48 = vpop.f32.mrf.mxu1  ;;  %1183 = vst [vmem:[%s1418_s15 + $0x28] sm:$0xff] %v1177_v46   ;;  %v696_v50 = vunpack.c.l.b16 %v637_v45 }
 0x103   : > { %v582_v51 = vadd.f32 %v581_v48, %v539_v47  ;;  %v839_v47 = vadd.s32 %v1459_v12, %v825_v36 }
 0x104   : > { %v703_v52 = vpack.c.b16 %v696_v50, %v695_v49  ;;  %v827_v49 = vadd.s32 72, %v1453_v6 }
 0x105   : > { %vm598_vm14 = vcmp.gt.f32.partialorder %v582_v51, 0.0  ;;  %v612_v53 = vmul.f32 %v1407_v7, %v582_v51  ;;  %v1450_v7 = vld [vmem:[%s1508_s4] ss:$0 sm:$0xff]  ;;  %vm852_vm6 = vcmp.lt.s32.totalorder %v839_v47, 200 }
 0x106   : > { %793 = vmatmul.bf16.gmra.mxu2 %v703_v52 }
 0x107   : > { %v625_v54 = vsel %vm598_vm14, %v582_v51, %v612_v53 }
 0x108   : > { %v540_v55 = vpop.f32.mrf.mxu3  ;;  %v638_v56 = vpack.c.bf16 %v625_v54, %v625_v54 }
 0x109   : > { %v840_v55 = vadd.s32 %v1459_v12, %v826_v44 }
 0x10a   : > { %v583_v57 = vpop.f32.mrf.mxu1  ;;  %651 = vst [vmem:[%s1418_s15 + $0x30] sm:$0xf] %v638_v56  ;;  %v697_v58 = vunpack.c.l.b16 %v638_v56  ;;  %v828_v56 = vadd.s32 80, %v1453_v6 }
 0x10b   : > { %vm853_vm7 = vcmp.lt.s32.totalorder %v840_v55, 200 }
 0x10c   : > { %v704_v59 = vpack.c.b16 %v697_v58, %v697_v58 }
 0x116   : > { %798 = vmatmul.bf16.gmra.mxu2 %v704_v59 }
 0x13c   : > { %v769_v0 = vpop.f32.mrf.mxu0 }
 0x13d   : > { %v770_v9 = vadd.f32 %v1450_v7, %v769_v0 }
 0x144   : > { %v771_v5 = vpop.f32.mrf.mxu0 }
 0x145   : > { %v772_v8 = vadd.f32 %v1450_v7, %v771_v5 }
 0x147   : > { %1210 = vtanh.f32 %v772_v8 }
 0x148   : > { %1212 = vtanh.f32 %v770_v9  ;;  %v830_v9 = vadd.s32 96, %v1453_v6 }
 0x149   : > { %v774_v2 = vpop.f32.mrf.mxu2 }
 0x14a   : > { %v775_v11 = vadd.f32 %v1450_v7, %v774_v2 }
 0x14c   : > { %1214 = vtanh.f32 %v775_v11 }
 0x14d   : > { %v1211_v23 = vpop.eup %1210 }
 0x14e   : > { %v1213_v25 = vpop.eup %1212  ;;  %v859_v32 = vsel %vm846_vm15, %v1211_v23, 0.0 }
 0x14f   : > { %v858_v35 = vsel %vm845_vm0, %v1213_v25, 0.0 }
 0x150   : > { %v871_v40 = vadd.f32 %v859_v32, %v858_v35 }
 0x151   : > { %v776_v60 = vpop.f32.mrf.mxu2 }
 0x152   : > { %v777_v14 = vadd.f32 %v1450_v7, %v776_v60  ;;  %v1215_v28 = vpop.eup %1214  ;;  %v841_v60 = vadd.s32 %v1459_v12, %v827_v49 }
 0x153   : > { %v860_v37 = vsel %vm847_vm1, %v1215_v28, 0.0 }
 0x154   : > { %1216 = vtanh.f32 %v777_v14  ;;  %v872_v46 = vadd.f32 %v871_v40, %v860_v37  ;;  %vm854_vm8 = vcmp.lt.s32.totalorder %v841_v60, 200 }
 0x159   : > { %v779_v61 = vpop.f32.mrf.mxu2 }
 0x15a   : > { %v780_v19 = vadd.f32 %v1450_v7, %v779_v61  ;;  %v1217_v34 = vpop.eup %1216  ;;  %v829_v61 = vadd.s32 88, %v1453_v6 }
 0x15b   : > { %v861_v43 = vsel %vm848_vm2, %v1217_v34, 0.0 }
 0x15c   : > { %1218 = vtanh.f32 %v780_v19  ;;  %v873_v51 = vadd.f32 %v872_v46, %v861_v43  ;;  %v843_v8 = vadd.s32 %v1459_v12, %v829_v61  ;;  %v844_v19 = vadd.s32 %v1459_v12, %v830_v9 }
 0x15e   : > { %vm856_vm10 = vcmp.lt.s32.totalorder %v843_v8, 200  ;;  %vm857_vm11 = vcmp.lt.s32.totalorder %v844_v19, 200 }
 0x161   : > { %v781_v62 = vpop.f32.mrf.mxu2 }
 0x162   : > { %v782_v22 = vadd.f32 %v1450_v7, %v781_v62  ;;  %v1219_v42 = vpop.eup %1218 }
 0x163   : > { %v862_v52 = vsel %vm849_vm3, %v1219_v42, 0.0 }
 0x164   : > { %1220 = vtanh.f32 %v782_v22  ;;  %v874_v2 = vadd.f32 %v873_v51, %v862_v52 }
 0x169   : > { %v784_v63 = vpop.f32.mrf.mxu2 }
 0x16a   : > { %v785_v27 = vadd.f32 %v1450_v7, %v784_v63  ;;  %v1221_v48 = vpop.eup %1220 }
 0x16b   : > { %v863_v58 = vsel %vm850_vm4, %v1221_v48, 0.0 }
 0x16c   : > { %1222 = vtanh.f32 %v785_v27  ;;  %v875_v0 = vadd.f32 %v874_v2, %v863_v58 }
 0x171   : > { %v786_v1 = vpop.f32.mrf.mxu2 }
 0x172   : > { %v787_v33 = vadd.f32 %v1450_v7, %v786_v1  ;;  %v1223_v54 = vpop.eup %1222  ;;  %v842_v1 = vadd.s32 %v1459_v12, %v828_v56 }
 0x173   : > { %v864_v62 = vsel %vm851_vm5, %v1223_v54, 0.0 }
 0x174   : > { %1224 = vtanh.f32 %v787_v33  ;;  %v876_v5 = vadd.f32 %v875_v0, %v864_v62  ;;  %vm855_vm9 = vcmp.lt.s32.totalorder %v842_v1, 200 }
 0x179   : > { %v789_v4 = vpop.f32.mrf.mxu2 }
 0x17a   : > { %v790_v39 = vadd.f32 %v1450_v7, %v789_v4  ;;  %v1225_v59 = vpop.eup %1224 }
 0x17b   : > { %v865_v3 = vsel %vm852_vm6, %v1225_v59, 0.0 }
 0x17c   : > { %1226 = vtanh.f32 %v790_v39  ;;  %v877_v14 = vadd.f32 %v876_v5, %v865_v3 }
 0x181   : > { %v791_v15 = vpop.f32.mrf.mxu2 }
 0x182   : > { %v792_v45 = vadd.f32 %v1450_v7, %v791_v15  ;;  %v1227_v63 = vpop.eup %1226 }
 0x183   : > { %v866_v10 = vsel %vm853_vm7, %v1227_v63, 0.0 }
 0x184   : > { %1228 = vtanh.f32 %v792_v45  ;;  %v878_v18 = vadd.f32 %v877_v14, %v866_v10 }
 0x189   : > { %v794_v31 = vpop.f32.mrf.mxu2 }
 0x18a   : > { %v795_v50 = vadd.f32 %v1450_v7, %v794_v31  ;;  %v1229_v4 = vpop.eup %1228 }
 0x18b   : > { %v867_v16 = vsel %vm854_vm8, %v1229_v4, 0.0 }
 0x18c   : > { %1230 = vtanh.f32 %v795_v50  ;;  %v879_v21 = vadd.f32 %v878_v18, %v867_v16 }
 0x191   : > { %v796_v53 = vpop.f32.mrf.mxu2 }
 0x192   : > { %v797_v57 = vadd.f32 %v1450_v7, %v796_v53  ;;  %v1231_v13 = vpop.eup %1230 }
 0x193   : > { %v868_v20 = vsel %vm855_vm9, %v1231_v13, 0.0 }
 0x194   : > { %1232 = vtanh.f32 %v797_v57  ;;  %v880_v6 = vadd.f32 %v879_v21, %v868_v20 }
 0x199   : > { %v799_v11 = vpop.f32.mrf.mxu2 }
 0x19a   : > { %v800_v15 = vadd.f32 %v1450_v7, %v799_v11  ;;  %v1233_v17 = vpop.eup %1232 }
 0x19b   : > { %v869_v22 = vsel %vm856_vm10, %v1233_v17, 0.0 }
 0x19c   : > { %1234 = vtanh.f32 %v800_v15  ;;  %v881_v25 = vadd.f32 %v880_v6, %v869_v22 }
 0x1a1   : > { %v801_v23 = vpop.f32.mrf.mxu2 }
 0x1a2   : > { %v1235_v24 = vpop.eup %1234 }
 0x1a3   : > { %v870_v26 = vsel %vm857_vm11, %v1235_v24, 0.0 }
 0x1a4   : > { %v882_v27 = vadd.f32 %v881_v25, %v870_v26 }
 0x1a6   : > { %v883_v7 = vrot.slane %v882_v27, 4 }
 0x1a8   : > { %v884_v28 = vadd.f32 %v883_v7, %v882_v27 }
 0x1aa   : > { %v885_v29 = vrot.slane %v884_v28, 2 }
 0x1ac   : > { %v886_v30 = vadd.f32 %v885_v29, %v884_v28 }
 0x1ae   : > { %v887_v31 = vrot.slane %v886_v30, 1 }
 0x1b0   : > { %v888_v12 = vadd.f32 %v887_v31, %v886_v30 }
 0x1b2   : > { %889 = vst [vmem:[%s294_s20] sm:$0x1] %v888_v12 }
 0x1b3 PF: > { %s19_s26 = sadd.s32 1, %s1242_s26  }
 0x1b4   : > { %p16_p5 = scmp.ge.s32.totalorder %s19_s26, 4  }
 0x1b6   :  { %18 = sbr.rel (!%p16_p5) target bundleno = 2 (0x2), region = 86 }

// kernel: mp_encoder_forward.7
= control target key start
LH: loop header
LB: loop body
LE: loop exit
PB: predicated region body
PF: predicated region fallthrough
CT: control target
= control target key end

     0   :  { %s1364_s26 = smov 0   ;;  %s1554_s0 = inlined_call_operand.vmem [shape: bf16[256,256], index: 0, kind: input, shape index: {}]   ;;  %s1555_s1 = inlined_call_operand.vmem [shape: bf16[256,128], index: 1, kind: input, shape index: {}]   ;;  %s1556_s2 = inlined_call_operand.vmem [shape: f32[1,128], index: 2, kind: input, shape index: {}]   ;;  %s1557_s3 = inlined_call_operand.vmem [shape: bf16[128,128], index: 3, kind: input, shape index: {}]   ;;  %s1558_s4 = inlined_call_operand.vmem [shape: f32[1,128], index: 4, kind: input, shape index: {}]   ;;  %s1559_s5 = inlined_call_operand.<no memory space> [shape: f32[1,1], index: 5, kind: input, shape index: {}]   ;;  %s1560_s6 = inlined_call_operand.vmem [shape: bf16[256,128], index: 6, kind: output, shape index: {0}]   ;;  %s1561_s7 = inlined_call_operand.vmem [shape: f32[2,1,128], index: 7, kind: output, shape index: {1}]  }
   0x1   :  { %13 = sst [smem:[#allocation2]] %s1559_s5 }
   0x2 LB: > { %s1370_s27 = sadd.s32 4294967295, %s1319_s26   ;;  %p991_p0 = scmp.ge.s32.totalorder %s1319_s26, 1  ;;  %s1319_s26 = sphi %s1364_s26, %s19_s26  }
   0x3   : > { %p243_p1 = scmp.lt.s32.totalorder %s1319_s26, 3 }
   0x5   : > { %p244_p2 = pnand %p991_p0, %p243_p1 }
   0x6   : > { %s992_s16 = sshll.u32 (!%p244_p2), %s1370_s27, 4  ;;  %s621_s14 = sld [smem:[#allocation2]] (!%p244_p2) }
   0x7   : > { %247 = sbr.rel (%p244_p2) target bundleno = 443 (0x1bb), region = 44  ;;  %p280_p3 = scmp.lt.s32.totalorder (!%p244_p2), %s992_s16, 31 }
   0x8   : > { %p292_p4 = scmp.lt.s32.totalorder (!%p244_p2), %s1370_s27, 1 }
   0xc   : > { %v1183_v0 = vld [vmem:[%s1555_s1 + $0x38] sm:$0xff]  ;;  %v1182_v2 = vld [vmem:[%s1555_s1 + $0x30] sm:$0xff]  ;;  %v1181_v4 = vld [vmem:[%s1555_s1 + $0x28] sm:$0xff]  ;;  %s1563_s16 = smov (!%p280_p3, %s992_s16), 31  ;;  %s1565_s27 = smov (!%p292_p4, %s1370_s27), 1 }
   0xd   : > { %v1191_v1 = vld [vmem:[%s1555_s1 + $0x78] sm:$0xff]  ;;  %523 = vmatpush.bf16.msra.mxu0 %v1183_v0  ;;  %1247 = vmatpush.bf16.msra.mxu3 %v1183_v0  ;;  %v1190_v3 = vld [vmem:[%s1555_s1 + $0x70] sm:$0xff]  ;;  %v1189_v5 = vld [vmem:[%s1555_s1 + $0x68] sm:$0xff]  ;;  %s1159_s30 = sshll.u32 %s1563_s16, 3  ;;  %s996_s18 = sshll.u32 %s1563_s16, 2 }
   0xe   : > { %572 = vmatpush.bf16.msra.mxu1 %v1191_v1  ;;  %v1180_v6 = vld [vmem:[%s1555_s1 + $0x20] sm:$0xff]  ;;  %v1179_v8 = vld [vmem:[%s1555_s1 + $0x18] sm:$0xff]  ;;  %v1178_v10 = vld [vmem:[%s1555_s1 + $0x10] sm:$0xff]  ;;  %s1420_s12 = scalar_lea.vmem %s1554_s0, %s1159_s30  ;;  %s1502_s21 = scalar_lea.vmem %s1560_s6, %s996_s18 }
   0xf   : > { %v1188_v7 = vld [vmem:[%s1555_s1 + $0x60] sm:$0xff]  ;;  %v1187_v9 = vld [vmem:[%s1555_s1 + $0x58] sm:$0xff]  ;;  %v1186_v11 = vld [vmem:[%s1555_s1 + $0x50] sm:$0xff]  ;;  %s294_s25 = scalar_lea.vmem %s1561_s7, %s1565_s27 }
  0x10   : > { %v1177_v12 = vld [vmem:[%s1555_s1 + $0x8] sm:$0xff]  ;;  %v1176_v14 = vld [vmem:[%s1555_s1] sm:$0xff]  ;;  %v1007_v25 = vld [vmem:[%s1420_s12 + $0x10] sm:$0xf] }
  0x11   : > { %524 = vmatpush.bf16.msra.mxu0 %v1182_v2  ;;  %1248 = vmatpush.bf16.msra.mxu3 %v1182_v2  ;;  %v1185_v13 = vld [vmem:[%s1555_s1 + $0x48] sm:$0xff]  ;;  %v999_v15 = vld [vmem:[%s1420_s12] sm:$0xf]  ;;  %v1160_v20 = vld [vmem:[%s1420_s12 + $0x4] sm:$0xf] }
  0x12   : > { %573 = vmatpush.bf16.msra.mxu1 %v1190_v3  ;;  %v1161_v16 = vld [vmem:[%s1420_s12 + $0x4] sm:$0xf0]  ;;  %v1047_v17 = vld [vmem:[%s1420_s12 + $0x60] sm:$0xf]  ;;  %v1001_v21 = vld [vmem:[%s1420_s12 + $0x8] sm:$0xf0] }
  0x13   : > { %v1173_v18 = vld [vmem:[%s1420_s12 + $0x64] sm:$0xf0]  ;;  %v1184_v19 = vld [vmem:[%s1555_s1 + $0x40] sm:$0xff]  ;;  %v1000_v22 = vor.u32 %v1161_v16, %v999_v15  ;;  %v1004_v24 = vor.u32 %v1160_v20, %v1001_v21  ;;  %v1163_v26 = vld [vmem:[%s1420_s12 + $0x14] sm:$0xf0] }
  0x14   : > { %v1048_v23 = vor.u32 %v1173_v18, %v1047_v17  ;;  %v1055_v27 = vld [vmem:[%s1420_s12 + $0x70] sm:$0xf]  ;;  %v1175_v28 = vld [vmem:[%s1420_s12 + $0x74] sm:$0xf0]  ;;  %v1162_v29 = vld [vmem:[%s1420_s12 + $0x14] sm:$0xf]  ;;  %v1008_v31 = vor.u32 %v1163_v26, %v1007_v25 }
  0x15   : > { %525 = vmatpush.bf16.msra.mxu0 %v1181_v4  ;;  %1249 = vmatpush.bf16.msra.mxu3 %v1181_v4  ;;  %v1009_v30 = vld [vmem:[%s1420_s12 + $0x18] sm:$0xf0]  ;;  %v1056_v32 = vor.u32 %v1175_v28, %v1055_v27  ;;  %v1015_v34 = vld [vmem:[%s1420_s12 + $0x20] sm:$0xf]  ;;  %v1165_v35 = vld [vmem:[%s1420_s12 + $0x24] sm:$0xf0] }
  0x16   : > { %574 = vmatpush.bf16.msra.mxu1 %v1189_v5  ;;  %v1012_v33 = vor.u32 %v1162_v29, %v1009_v30  ;;  %v1172_v36 = vld [vmem:[%s1420_s12 + $0x64] sm:$0xf]  ;;  %v1049_v37 = vld [vmem:[%s1420_s12 + $0x68] sm:$0xf0]  ;;  %v1016_v40 = vor.u32 %v1165_v35, %v1015_v34  ;;  %v1023_v43 = vld [vmem:[%s1420_s12 + $0x30] sm:$0xf] }
  0x17   : > { %v1164_v38 = vld [vmem:[%s1420_s12 + $0x24] sm:$0xf]  ;;  %v1017_v39 = vld [vmem:[%s1420_s12 + $0x28] sm:$0xf0]  ;;  %v1052_v41 = vor.u32 %v1172_v36, %v1049_v37  ;;  %v1167_v44 = vld [vmem:[%s1420_s12 + $0x34] sm:$0xf0] }
  0x18   : > { %v1020_v42 = vor.u32 %v1164_v38, %v1017_v39  ;;  %v1174_v45 = vld [vmem:[%s1420_s12 + $0x74] sm:$0xf]  ;;  %v1057_v46 = vld [vmem:[%s1420_s12 + $0x78] sm:$0xf0]  ;;  %v1024_v49 = vor.u32 %v1167_v44, %v1023_v43  ;;  %v1197_v54 = vld [vmem:[%s1557_s3 + $0x28] sm:$0xff] }
  0x19   : > { %526 = vmatpush.bf16.msra.mxu0 %v1180_v6  ;;  %1250 = vmatpush.bf16.msra.mxu3 %v1180_v6  ;;  %v1166_v47 = vld [vmem:[%s1420_s12 + $0x34] sm:$0xf]  ;;  %v1025_v48 = vld [vmem:[%s1420_s12 + $0x38] sm:$0xf0]  ;;  %v1060_v50 = vor.u32 %v1174_v45, %v1057_v46  ;;  %v1031_v55 = vld [vmem:[%s1420_s12 + $0x40] sm:$0xf] }
  0x1a   : > { %575 = vmatpush.bf16.msra.mxu1 %v1188_v7  ;;  %v1028_v51 = vor.u32 %v1166_v47, %v1025_v48  ;;  %v1199_v52 = vld [vmem:[%s1557_s3 + $0x38] sm:$0xff]  ;;  %v1198_v53 = vld [vmem:[%s1557_s3 + $0x30] sm:$0xff]  ;;  %v1169_v56 = vld [vmem:[%s1420_s12 + $0x44] sm:$0xf0] }
  0x1b   : > { %819 = vmatpush.bf16.msra.mxu2 %v1199_v52  ;;  %v1168_v57 = vld [vmem:[%s1420_s12 + $0x44] sm:$0xf]  ;;  %v1033_v58 = vld [vmem:[%s1420_s12 + $0x48] sm:$0xf0]  ;;  %v1032_v59 = vor.u32 %v1169_v56, %v1031_v55  ;;  %v1039_v61 = vld [vmem:[%s1420_s12 + $0x50] sm:$0xf] }
  0x1c   : > { %v1036_v60 = vor.u32 %v1168_v57, %v1033_v58  ;;  %v1171_v62 = vld [vmem:[%s1420_s12 + $0x54] sm:$0xf0]  ;;  %v1170_v63 = vld [vmem:[%s1420_s12 + $0x54] sm:$0xf]  ;;  %v1041_v0 = vld [vmem:[%s1420_s12 + $0x58] sm:$0xf0] }
  0x1d   : > { %527 = vmatpush.bf16.msra.mxu0 %v1179_v8  ;;  %1251 = vmatpush.bf16.msra.mxu3 %v1179_v8  ;;  %v1044_v2 = vor.u32 %v1170_v63, %v1041_v0  ;;  %v1195_v4 = vld [vmem:[%s1557_s3 + $0x18] sm:$0xff]  ;;  %v1193_v6 = vld [vmem:[%s1557_s3 + $0x8] sm:$0xff]  ;;  %v1490_v8 = vld [vmem:[%s1556_s2] ss:$0 sm:$0xff] }
  0x1e   : > { %576 = vmatpush.bf16.msra.mxu1 %v1187_v9 }
  0x1f   : > { %820 = vmatpush.bf16.msra.mxu2 %v1198_v53 }
  0x21   : > { %528 = vmatpush.bf16.msra.mxu0 %v1178_v10  ;;  %1252 = vmatpush.bf16.msra.mxu3 %v1178_v10 }
  0x22   : > { %577 = vmatpush.bf16.msra.mxu1 %v1186_v11 }
  0x23   : > { %821 = vmatpush.bf16.msra.mxu2 %v1197_v54 }
  0x25   : > { %529 = vmatpush.bf16.msra.mxu0 %v1177_v12  ;;  %1253 = vmatpush.bf16.msra.mxu3 %v1177_v12 }
  0x26   : > { %578 = vmatpush.bf16.msra.mxu1 %v1185_v13 }
  0x29   : > { %530 = vmatpush.bf16.msra.mxu0 %v1176_v14  ;;  %1254 = vmatpush.bf16.msra.mxu3 %v1176_v14 }
  0x2a   : > { %579 = vmatpush.bf16.msra.mxu1 %v1184_v19 }
  0x2c   : > { %531 = vmatmul.bf16.vlgmr.msra.gmra.mxu0 %v1000_v22  ;;  %561 = vmatmul.bf16.vlgmr.msra.gmra.mxu3 %v1048_v23 }
  0x2d   : > { %1255 = vmatpush.bf16.msrb.mxu3 %v1191_v1  ;;  %580 = vmatmul.bf16.vlgmr.msra.gmra.mxu1 %v1004_v24  ;;  %v1040_v1 = vor.u32 %v1171_v62, %v1039_v61 }
  0x31   : > { %1256 = vmatpush.bf16.msrb.mxu3 %v1190_v3  ;;  %v1196_v3 = vld [vmem:[%s1557_s3 + $0x20] sm:$0xff] }
  0x32   : > { %822 = vmatpush.bf16.msra.mxu2 %v1196_v3 }
  0x35   : > { %1257 = vmatpush.bf16.msrb.mxu3 %v1189_v5  ;;  %v1194_v5 = vld [vmem:[%s1557_s3 + $0x10] sm:$0xff] }
  0x36   : > { %823 = vmatpush.bf16.msra.mxu2 %v1195_v4 }
  0x39   : > { %1258 = vmatpush.bf16.msrb.mxu3 %v1188_v7  ;;  %v1192_v7 = vld [vmem:[%s1557_s3] sm:$0xff] }
  0x3a   : > { %824 = vmatpush.bf16.msra.mxu2 %v1194_v5 }
  0x3c   : > { %536 = vmatmul.bf16.gmra.mxu0 %v1008_v31  ;;  %566 = vmatmul.bf16.gmra.mxu3 %v1056_v32 }
  0x3d   : > { %1259 = vmatpush.bf16.msrb.mxu3 %v1187_v9  ;;  %585 = vmatmul.bf16.gmra.mxu1 %v1012_v33 }
  0x3e   : > { %825 = vmatpush.bf16.msra.mxu2 %v1193_v6 }
  0x41   : > { %1260 = vmatpush.bf16.msrb.mxu3 %v1186_v11 }
  0x42   : > { %826 = vmatpush.bf16.msra.mxu2 %v1192_v7 }
  0x45   : > { %1261 = vmatpush.bf16.msrb.mxu3 %v1185_v13  ;;  %v1493_v13 = vstv %s621_s14 }
  0x49   : > { %1262 = vmatpush.bf16.msrb.mxu3 %v1184_v19 }
  0x4c   : > { %541 = vmatmul.bf16.gmra.mxu0 %v1016_v40  ;;  %610 = vmatmul.bf16.vlgmr.msrb.gmra.mxu3 %v1052_v41 }
  0x4d   : > { %590 = vmatmul.bf16.gmra.mxu1 %v1020_v42  ;;  %1263 = vmatpush.bf16.msra.mxu3 %v1199_v52 }
  0x51   : > { %1264 = vmatpush.bf16.msra.mxu3 %v1198_v53 }
  0x55   : > { %1265 = vmatpush.bf16.msra.mxu3 %v1197_v54 }
  0x59   : > { %1266 = vmatpush.bf16.msra.mxu3 %v1196_v3 }
  0x5c   : > { %546 = vmatmul.bf16.gmra.mxu0 %v1024_v49  ;;  %615 = vmatmul.bf16.gmra.mxu3 %v1060_v50 }
  0x5d   : > { %595 = vmatmul.bf16.gmra.mxu1 %v1028_v51  ;;  %1267 = vmatpush.bf16.msra.mxu3 %v1195_v4 }
  0x61   : > { %1268 = vmatpush.bf16.msra.mxu3 %v1194_v5 }
  0x65   : > { %1269 = vmatpush.bf16.msra.mxu3 %v1193_v6 }
  0x69   : > { %1270 = vmatpush.bf16.msra.mxu3 %v1192_v7 }
  0x6c   : > { %551 = vmatmul.bf16.gmra.mxu0 %v1032_v59 }
  0x6d   : > { %600 = vmatmul.bf16.gmra.mxu1 %v1036_v60 }
  0x7c   : > { %556 = vmatmul.bf16.gmra.mxu0 %v1040_v1 }
  0x7d   : > { %605 = vmatmul.bf16.gmra.mxu1 %v1044_v2 }
  0xa9   : > { %v532_v9 = vpop.f32.mrf.mxu0 }
  0xaa   : > { %v533_v10 = vadd.f32 %v1490_v8, %v532_v9  ;;  %v581_v11 = vpop.f32.mrf.mxu1 }
  0xac   : > { %v582_v12 = vadd.f32 %v581_v11, %v533_v10 }
  0xae   : > { %v639_v15 = vmul.f32 %v1493_v13, %v582_v12  ;;  %vm622_vm0 = vcmp.gt.f32.partialorder %v582_v12, 0.0 }
  0xaf   : > { %v562_v14 = vpop.f32.mrf.mxu3 }
  0xb0   : > { %v655_v20 = vsel %vm622_vm0, %v582_v12, %v639_v15  ;;  %v563_v52 = vadd.f32 %v1490_v8, %v562_v14 }
  0xb1   : > { %v534_v16 = vpop.f32.mrf.mxu0  ;;  %v671_v23 = vpack.c.bf16 %v655_v20, %v655_v20 }
  0xb2   : > { %v535_v17 = vadd.f32 %v1490_v8, %v534_v16  ;;  %v583_v18 = vpop.f32.mrf.mxu1 }
  0xb3   : > { %v739_v30 = vunpack.c.l.b16 %v671_v23 }
  0xb4   : > { %v584_v19 = vadd.f32 %v583_v18, %v535_v17 }
  0xb6   : > { %vm623_vm1 = vcmp.gt.f32.partialorder %v584_v19, 0.0  ;;  %v640_v21 = vmul.f32 %v1493_v13, %v584_v19 }
  0xb7   : > { %v564_v22 = vpop.f32.mrf.mxu3 }
  0xb8   : > { %v656_v24 = vsel %vm623_vm1, %v584_v19, %v640_v21  ;;  %v565_v0 = vadd.f32 %v1490_v8, %v564_v22 }
  0xb9   : > { %v537_v25 = vpop.f32.mrf.mxu0  ;;  %v672_v26 = vpack.c.bf16 %v656_v24, %v656_v24  ;;  %v1203_v27 = vpack.c.bf16 %v656_v24, %v655_v20 }
  0xba   : > { %v538_v28 = vadd.f32 %v1490_v8, %v537_v25  ;;  %v586_v29 = vpop.f32.mrf.mxu1 }
  0xbb   : > { %1204 = vst [vmem:[%s1502_s21] sm:$0xff] %v1203_v27   ;;  %v740_v31 = vunpack.c.l.b16 %v672_v26 }
  0xbc   : > { %v587_v32 = vadd.f32 %v586_v29, %v538_v28 }
  0xbd   : > { %v755_v33 = vpack.c.b16 %v740_v31, %v739_v30 }
  0xbe   : > { %v641_v35 = vmul.f32 %v1493_v13, %v587_v32  ;;  %vm624_vm2 = vcmp.gt.f32.partialorder %v587_v32, 0.0 }
  0xbf   : > { %v567_v34 = vpop.f32.mrf.mxu3  ;;  %827 = vmatmul.bf16.vlgmr.msra.gmra.mxu2 %v755_v33 }
  0xc0   : > { %v657_v40 = vsel %vm624_vm2, %v587_v32, %v641_v35  ;;  %v568_v18 = vadd.f32 %v1490_v8, %v567_v34 }
  0xc1   : > { %v539_v36 = vpop.f32.mrf.mxu0  ;;  %v673_v43 = vpack.c.bf16 %v657_v40, %v657_v40 }
  0xc2   : > { %v540_v37 = vadd.f32 %v1490_v8, %v539_v36  ;;  %v588_v38 = vpop.f32.mrf.mxu1 }
  0xc3   : > { %v741_v50 = vunpack.c.l.b16 %v673_v43 }
  0xc4   : > { %v589_v39 = vadd.f32 %v588_v38, %v540_v37 }
  0xc6   : > { %vm625_vm3 = vcmp.gt.f32.partialorder %v589_v39, 0.0  ;;  %v642_v41 = vmul.f32 %v1493_v13, %v589_v39 }
  0xc7   : > { %v1509_v42 = vpop.f32.mrf.mxu3 }
  0xc8   : > { %v658_v44 = vsel %vm625_vm3, %v589_v39, %v642_v41  ;;  %v570_v36 = vadd.f32 %v1490_v8, %v1509_v42 }
  0xc9   : > { %v542_v45 = vpop.f32.mrf.mxu0  ;;  %v674_v46 = vpack.c.bf16 %v658_v44, %v658_v44  ;;  %v1208_v47 = vpack.c.bf16 %v658_v44, %v657_v40 }
  0xca   : > { %v543_v48 = vadd.f32 %v1490_v8, %v542_v45  ;;  %v591_v49 = vpop.f32.mrf.mxu1 }
  0xcb   : > { %1240 = vst [vmem:[%s1502_s21 + $0x8] sm:$0xff] %v1208_v47   ;;  %v742_v51 = vunpack.c.l.b16 %v674_v46 }
  0xcc   : > { %v592_v53 = vadd.f32 %v591_v49, %v543_v48 }
  0xcd   : > { %v756_v54 = vpack.c.b16 %v742_v51, %v741_v50 }
  0xce   : > { %v643_v56 = vmul.f32 %v1493_v13, %v592_v53  ;;  %vm626_vm4 = vcmp.gt.f32.partialorder %v592_v53, 0.0 }
  0xcf   : > { %v611_v55 = vpop.f32.mrf.mxu3  ;;  %832 = vmatmul.bf16.gmra.mxu2 %v756_v54 }
  0xd0   : > { %v612_v57 = vadd.f32 %v611_v55, %v563_v52  ;;  %v659_v63 = vsel %vm626_vm4, %v592_v53, %v643_v56 }
  0xd1   : > { %v544_v58 = vpop.f32.mrf.mxu0  ;;  %v675_v3 = vpack.c.bf16 %v659_v63, %v659_v63 }
  0xd2   : > { %v545_v59 = vadd.f32 %v1490_v8, %v544_v58  ;;  %v593_v60 = vpop.f32.mrf.mxu1  ;;  %v651_v61 = vmul.f32 %v1493_v13, %v612_v57  ;;  %vm634_vm5 = vcmp.gt.f32.partialorder %v612_v57, 0.0 }
  0xd3   : > { %v743_v16 = vunpack.c.l.b16 %v675_v3 }
  0xd4   : > { %v594_v62 = vadd.f32 %v593_v60, %v545_v59  ;;  %v667_v4 = vsel %vm634_vm5, %v612_v57, %v651_v61 }
  0xd5   : > { %v683_v15 = vpack.c.bf16 %v667_v4, %v667_v4 }
  0xd6   : > { %vm627_vm6 = vcmp.gt.f32.partialorder %v594_v62, 0.0  ;;  %v644_v1 = vmul.f32 %v1493_v13, %v594_v62 }
  0xd7   : > { %v613_v2 = vpop.f32.mrf.mxu3  ;;  %v751_v24 = vunpack.c.l.b16 %v683_v15 }
  0xd8   : > { %v614_v5 = vadd.f32 %v613_v2, %v565_v0  ;;  %v660_v6 = vsel %vm627_vm6, %v594_v62, %v644_v1 }
  0xd9   : > { %v547_v7 = vpop.f32.mrf.mxu0  ;;  %v676_v9 = vpack.c.bf16 %v660_v6, %v660_v6  ;;  %v1213_v10 = vpack.c.bf16 %v660_v6, %v659_v63 }
  0xda   : > { %vm635_vm7 = vcmp.gt.f32.partialorder %v614_v5, 0.0  ;;  %v652_v11 = vmul.f32 %v1493_v13, %v614_v5  ;;  %v548_v12 = vadd.f32 %v1490_v8, %v547_v7  ;;  %v596_v14 = vpop.f32.mrf.mxu1 }
  0xdb   : > { %1241 = vst [vmem:[%s1502_s21 + $0x10] sm:$0xff] %v1213_v10   ;;  %v744_v17 = vunpack.c.l.b16 %v676_v9 }
  0xdc   : > { %v668_v19 = vsel %vm635_vm7, %v614_v5, %v652_v11  ;;  %v597_v20 = vadd.f32 %v596_v14, %v548_v12 }
  0xdd   : > { %v684_v21 = vpack.c.bf16 %v668_v19, %v668_v19  ;;  %v1233_v22 = vpack.c.bf16 %v668_v19, %v667_v4  ;;  %v757_v23 = vpack.c.b16 %v744_v17, %v743_v16 }
  0xde   : > { %v645_v27 = vmul.f32 %v1493_v13, %v597_v20  ;;  %vm628_vm8 = vcmp.gt.f32.partialorder %v597_v20, 0.0 }
  0xdf   : > { %1245 = vst [vmem:[%s1502_s21 + $0x30] sm:$0xff] %v1233_v22   ;;  %v752_v25 = vunpack.c.l.b16 %v684_v21  ;;  %v616_v26 = vpop.f32.mrf.mxu3  ;;  %837 = vmatmul.bf16.gmra.mxu2 %v757_v23 }
  0xe0   : > { %v617_v28 = vadd.f32 %v616_v26, %v568_v18  ;;  %v661_v35 = vsel %vm628_vm8, %v597_v20, %v645_v27 }
  0xe1   : > { %v549_v29 = vpop.f32.mrf.mxu0  ;;  %v761_v30 = vpack.c.b16 %v752_v25, %v751_v24  ;;  %v677_v39 = vpack.c.bf16 %v661_v35, %v661_v35 }
  0xe2   : > { %v550_v31 = vadd.f32 %v1490_v8, %v549_v29  ;;  %v598_v32 = vpop.f32.mrf.mxu1  ;;  %v653_v33 = vmul.f32 %v1493_v13, %v617_v28  ;;  %vm636_vm9 = vcmp.gt.f32.partialorder %v617_v28, 0.0 }
  0xe3   : > { %857 = vmatmul.bf16.vlgmr.msra.gmra.mxu3 %v761_v30  ;;  %v745_v42 = vunpack.c.l.b16 %v677_v39 }
  0xe4   : > { %v599_v34 = vadd.f32 %v598_v32, %v550_v31  ;;  %v669_v43 = vsel %vm636_vm9, %v617_v28, %v653_v33 }
  0xe5   : > { %v685_v51 = vpack.c.bf16 %v669_v43, %v669_v43 }
  0xe6   : > { %vm629_vm10 = vcmp.gt.f32.partialorder %v599_v34, 0.0  ;;  %v646_v37 = vmul.f32 %v1493_v13, %v599_v34 }
  0xe7   : > { %v618_v38 = vpop.f32.mrf.mxu3  ;;  %v753_v57 = vunpack.c.l.b16 %v685_v51 }
  0xe8   : > { %v619_v40 = vadd.f32 %v618_v38, %v570_v36  ;;  %v662_v41 = vsel %vm629_vm10, %v599_v34, %v646_v37 }
  0xe9   : > { %v552_v44 = vpop.f32.mrf.mxu0  ;;  %v678_v45 = vpack.c.bf16 %v662_v41, %v662_v41  ;;  %v1218_v46 = vpack.c.bf16 %v662_v41, %v661_v35 }
  0xea   : > { %vm637_vm11 = vcmp.gt.f32.partialorder %v619_v40, 0.0  ;;  %v654_v47 = vmul.f32 %v1493_v13, %v619_v40  ;;  %v553_v48 = vadd.f32 %v1490_v8, %v552_v44  ;;  %v601_v49 = vpop.f32.mrf.mxu1 }
  0xeb   : > { %1242 = vst [vmem:[%s1502_s21 + $0x18] sm:$0xff] %v1218_v46   ;;  %v746_v50 = vunpack.c.l.b16 %v678_v45 }
  0xec   : > { %v602_v52 = vadd.f32 %v601_v49, %v553_v48  ;;  %v670_v53 = vsel %vm637_vm11, %v619_v40, %v654_v47 }
  0xed   : > { %v758_v54 = vpack.c.b16 %v746_v50, %v745_v42  ;;  %v686_v55 = vpack.c.bf16 %v670_v53, %v670_v53  ;;  %v1238_v56 = vpack.c.bf16 %v670_v53, %v669_v43 }
  0xee   : > { %v647_v59 = vmul.f32 %v1493_v13, %v602_v52  ;;  %vm630_vm12 = vcmp.gt.f32.partialorder %v602_v52, 0.0 }
  0xef   : > { %842 = vmatmul.bf16.gmra.mxu2 %v758_v54  ;;  %1246 = vst [vmem:[%s1502_s21 + $0x38] sm:$0xff] %v1238_v56   ;;  %v754_v58 = vunpack.c.l.b16 %v686_v55 }
  0xf0   : > { %v663_v1 = vsel %vm630_vm12, %v602_v52, %v647_v59 }
  0xf1   : > { %v554_v60 = vpop.f32.mrf.mxu0  ;;  %v762_v61 = vpack.c.b16 %v754_v58, %v753_v57  ;;  %v679_v3 = vpack.c.bf16 %v663_v1, %v663_v1 }
  0xf2   : > { %v555_v62 = vadd.f32 %v1490_v8, %v554_v60  ;;  %v603_v63 = vpop.f32.mrf.mxu1 }
  0xf3   : > { %862 = vmatmul.bf16.gmra.mxu3 %v762_v61  ;;  %v747_v11 = vunpack.c.l.b16 %v679_v3 }
  0xf4   : > { %v604_v0 = vadd.f32 %v603_v63, %v555_v62 }
  0xf6   : > { %vm631_vm13 = vcmp.gt.f32.partialorder %v604_v0, 0.0  ;;  %v648_v2 = vmul.f32 %v1493_v13, %v604_v0 }
  0xf8   : > { %v664_v4 = vsel %vm631_vm13, %v604_v0, %v648_v2 }
  0xf9   : > { %v557_v5 = vpop.f32.mrf.mxu0  ;;  %v680_v6 = vpack.c.bf16 %v664_v4, %v664_v4  ;;  %v1223_v7 = vpack.c.bf16 %v664_v4, %v663_v1 }
  0xfa   : > { %v558_v9 = vadd.f32 %v1490_v8, %v557_v5  ;;  %v606_v10 = vpop.f32.mrf.mxu1 }
  0xfb   : > { %1243 = vst [vmem:[%s1502_s21 + $0x20] sm:$0xff] %v1223_v7   ;;  %v748_v12 = vunpack.c.l.b16 %v680_v6 }
  0xfc   : > { %v607_v14 = vadd.f32 %v606_v10, %v558_v9 }
  0xfd   : > { %v759_v15 = vpack.c.b16 %v748_v12, %v747_v11 }
  0xfe   : > { %v649_v16 = vmul.f32 %v1493_v13, %v607_v14  ;;  %vm632_vm14 = vcmp.gt.f32.partialorder %v607_v14, 0.0 }
  0xff   : > { %847 = vmatmul.bf16.gmra.mxu2 %v759_v15 }
 0x100   : > { %v665_v21 = vsel %vm632_vm14, %v607_v14, %v649_v16 }
 0x101   : > { %v559_v17 = vpop.f32.mrf.mxu0  ;;  %v681_v23 = vpack.c.bf16 %v665_v21, %v665_v21 }
 0x102   : > { %v560_v18 = vadd.f32 %v1490_v8, %v559_v17  ;;  %v608_v19 = vpop.f32.mrf.mxu1 }
 0x103   : > { %v749_v27 = vunpack.c.l.b16 %v681_v23 }
 0x104   : > { %v609_v20 = vadd.f32 %v608_v19, %v560_v18 }
 0x106   : > { %vm633_vm15 = vcmp.gt.f32.partialorder %v609_v20, 0.0  ;;  %v650_v22 = vmul.f32 %v1493_v13, %v609_v20  ;;  %v1280_v13 = vld [vmem:[%s1558_s4] ss:$0 sm:$0xff] }
 0x108   : > { %v666_v24 = vsel %vm633_vm15, %v609_v20, %v650_v22 }
 0x109   : > { %v682_v25 = vpack.c.bf16 %v666_v24, %v666_v24  ;;  %v1228_v26 = vpack.c.bf16 %v666_v24, %v665_v21 }
 0x10b   : > { %1244 = vst [vmem:[%s1502_s21 + $0x28] sm:$0xff] %v1228_v26   ;;  %v750_v28 = vunpack.c.l.b16 %v682_v25 }
 0x10d   : > { %v760_v29 = vpack.c.b16 %v750_v28, %v749_v27 }
 0x10f   : > { %852 = vmatmul.bf16.gmra.mxu2 %v760_v29 }
 0x142   : > { %v828_v30 = vpop.f32.mrf.mxu2 }
 0x143   : > { %v829_v40 = vadd.f32 %v1280_v13, %v828_v30 }
 0x14a   : > { %v830_v31 = vpop.f32.mrf.mxu2 }
 0x14b   : > { %v831_v39 = vadd.f32 %v1280_v13, %v830_v31 }
 0x14d   : > { %1281 = vtanh.f32 %v831_v39 }
 0x14e   : > { %1283 = vtanh.f32 %v829_v40 }
 0x152   : > { %v833_v32 = vpop.f32.mrf.mxu2 }
 0x153   : > { %v834_v41 = vadd.f32 %v1280_v13, %v833_v32  ;;  %v1282_v48 = vpop.eup %1281 }
 0x154   : > { %v1284_v42 = vpop.eup %1283 }
 0x155   : > { %1285 = vtanh.f32 %v834_v41  ;;  %v884_v52 = vadd.f32 %v1284_v42, %v1282_v48 }
 0x15a   : > { %v835_v33 = vpop.f32.mrf.mxu2 }
 0x15b   : > { %v836_v43 = vadd.f32 %v1280_v13, %v835_v33  ;;  %v1286_v50 = vpop.eup %1285 }
 0x15c   : > { %v885_v55 = vadd.f32 %v1286_v50, %v884_v52 }
 0x15d   : > { %1287 = vtanh.f32 %v836_v43 }
 0x162   : > { %v838_v8 = vpop.f32.mrf.mxu2 }
 0x163   : > { %v839_v44 = vadd.f32 %v1280_v13, %v838_v8  ;;  %v1288_v53 = vpop.eup %1287 }
 0x164   : > { %v886_v59 = vadd.f32 %v1288_v53, %v885_v55 }
 0x165   : > { %1289 = vtanh.f32 %v839_v44 }
 0x166   : > { %v858_v37 = vpop.f32.mrf.mxu3 }
 0x167   : > { %v859_v6 = vadd.f32 %v1280_v13, %v858_v37 }
 0x16a   : > { %v840_v34 = vpop.f32.mrf.mxu2 }
 0x16b   : > { %v841_v47 = vadd.f32 %v1280_v13, %v840_v34  ;;  %v1290_v57 = vpop.eup %1289 }
 0x16c   : > { %v887_v63 = vadd.f32 %v1290_v57, %v886_v59 }
 0x16d   : > { %1291 = vtanh.f32 %v841_v47 }
 0x16e   : > { %v860_v45 = vpop.f32.mrf.mxu3 }
 0x16f   : > { %v861_v11 = vadd.f32 %v1280_v13, %v860_v45 }
 0x172   : > { %v843_v35 = vpop.f32.mrf.mxu2 }
 0x173   : > { %v844_v49 = vadd.f32 %v1280_v13, %v843_v35  ;;  %v1292_v61 = vpop.eup %1291 }
 0x174   : > { %v888_v1 = vadd.f32 %v1292_v61, %v887_v63 }
 0x175   : > { %1293 = vtanh.f32 %v844_v49 }
 0x176   : > { %v863_v60 = vpop.f32.mrf.mxu3 }
 0x177   : > { %v864_v16 = vadd.f32 %v1280_v13, %v863_v60 }
 0x17a   : > { %v845_v36 = vpop.f32.mrf.mxu2 }
 0x17b   : > { %v846_v51 = vadd.f32 %v1280_v13, %v845_v36  ;;  %v1294_v0 = vpop.eup %1293 }
 0x17c   : > { %v889_v3 = vadd.f32 %v1294_v0, %v888_v1 }
 0x17d   : > { %1295 = vtanh.f32 %v846_v51 }
 0x17e   : > { %v865_v12 = vpop.f32.mrf.mxu3 }
 0x17f   : > { %v866_v18 = vadd.f32 %v1280_v13, %v865_v12 }
 0x182   : > { %v848_v38 = vpop.f32.mrf.mxu2 }
 0x183   : > { %v849_v54 = vadd.f32 %v1280_v13, %v848_v38  ;;  %v1296_v2 = vpop.eup %1295 }
 0x184   : > { %v890_v9 = vadd.f32 %v1296_v2, %v889_v3 }
 0x185   : > { %1297 = vtanh.f32 %v849_v54 }
 0x18a   : > { %v850_v46 = vpop.f32.mrf.mxu2 }
 0x18b   : > { %v851_v58 = vadd.f32 %v1280_v13, %v850_v46  ;;  %v1298_v5 = vpop.eup %1297 }
 0x18c   : > { %v891_v14 = vadd.f32 %v1298_v5, %v890_v9 }
 0x18d   : > { %1299 = vtanh.f32 %v851_v58 }
 0x192   : > { %v853_v56 = vpop.f32.mrf.mxu2 }
 0x193   : > { %v854_v62 = vadd.f32 %v1280_v13, %v853_v56  ;;  %v1300_v10 = vpop.eup %1299 }
 0x194   : > { %v892_v17 = vadd.f32 %v1300_v10, %v891_v14 }
 0x195   : > { %1301 = vtanh.f32 %v854_v62 }
 0x19a   : > { %v855_v4 = vpop.f32.mrf.mxu2 }
 0x19b   : > { %v856_v7 = vadd.f32 %v1280_v13, %v855_v4  ;;  %v1302_v15 = vpop.eup %1301 }
 0x19c   : > { %v893_v19 = vadd.f32 %v1302_v15, %v892_v17 }
 0x19d   : > { %1303 = vtanh.f32 %v856_v7 }
 0x19e   : > { %1305 = vtanh.f32 %v859_v6 }
 0x19f   : > { %1307 = vtanh.f32 %v861_v11 }
 0x1a0   : > { %1309 = vtanh.f32 %v864_v16 }
 0x1a1   : > { %1311 = vtanh.f32 %v866_v18 }
 0x1a3   : > { %v1304_v20 = vpop.eup %1303 }
 0x1a4   : > { %v894_v21 = vadd.f32 %v1304_v20, %v893_v19  ;;  %v1306_v22 = vpop.eup %1305 }
 0x1a5   : > { %v1308_v24 = vpop.eup %1307 }
 0x1a6   : > { %v895_v23 = vadd.f32 %v1306_v22, %v894_v21  ;;  %v1310_v26 = vpop.eup %1309 }
 0x1a7   : > { %v1312_v28 = vpop.eup %1311 }
 0x1a8   : > { %v896_v25 = vadd.f32 %v1308_v24, %v895_v23 }
 0x1aa   : > { %v897_v27 = vadd.f32 %v1310_v26, %v896_v25 }
 0x1ac   : > { %v898_v29 = vadd.f32 %v1312_v28, %v897_v27 }
 0x1ae   : > { %v899_v30 = vrot.slane %v898_v29, 4 }
 0x1b0   : > { %v900_v31 = vadd.f32 %v899_v30, %v898_v29 }
 0x1b2   : > { %v901_v32 = vrot.slane %v900_v31, 2 }
 0x1b4   : > { %v902_v33 = vadd.f32 %v901_v32, %v900_v31 }
 0x1b6   : > { %v903_v8 = vrot.slane %v902_v33, 1 }
 0x1b8   : > { %v904_v34 = vadd.f32 %v903_v8, %v902_v33 }
 0x1ba   : > { %905 = vst [vmem:[%s294_s25] sm:$0x1] %v904_v34 }
 0x1bb PF: > { %s19_s26 = sadd.s32 1, %s1319_s26  }
 0x1bc   : > { %p16_p5 = scmp.ge.s32.totalorder %s19_s26, 4  }
 0x1be   :  { %18 = sbr.rel (!%p16_p5) target bundleno = 2 (0x2), region = 86 }

// kernel: mp_encoder_forward.9
= control target key start
LH: loop header
LB: loop body
LE: loop exit
PB: predicated region body
PF: predicated region fallthrough
CT: control target
= control target key end

     0   :  { %8 = vsyncpa [#allocation3], 0  ;;  %s584_s12 = smov 0   ;;  %s697_s0 = inlined_call_operand.vmem [shape: f32[2], index: 0, kind: input, shape index: {}]   ;;  %s698_s1 = inlined_call_operand.vmem [shape: bf16[256,128], index: 1, kind: input, shape index: {}]   ;;  %s699_s2 = inlined_call_operand.vmem [shape: bf16[256,128], index: 2, kind: input, shape index: {}]   ;;  %s700_s3 = inlined_call_operand.vmem [shape: f32[256,64], index: 3, kind: output, shape index: {}]  }
   0x1 LB: > { %s423_s13 = sadd.s32 4294967295, %s561_s12   ;;  %p425_p0 = scmp.ge.s32.totalorder %s561_s12, 1  ;;  %s561_s12 = sphi %s584_s12, %s14_s12  }
   0x2   : > { %p118_p1 = scmp.lt.s32.totalorder %s561_s12, 3  ;;  %s130_s16 = sshll.u32 %s697_s0, 4  ;;  %s131_s16 = int_to_ptr.vmem [resolvable:$true] %s130_s16 }
   0x3   : > { %p525_p3 = scmp.eq.s32.totalorder %s423_s13, 0  ;;  %s563_s17 = smov [#allocation2]  }
   0x4   : > { %p119_p2 = pnand %p425_p0, %p118_p1 }
   0x6   : > { %p521_p4 = pneg %p119_p2  ;;  %161 = sbr.rel (%p119_p2) target bundleno = 46 (0x2e), region = 32 }
   0x8   : > { %p522_p5 = pnand %p525_p3, %p521_p4 }
   0xa   : > { %524 = dma.vmem_to_smem (!%p522_p5), %s131_s16, 16, %s563_s17, [#allocation3]  }
   0xb   : > { %556 = dma.done.wait (%p525_p3), [#allocation3], 16  }
   0xc   : > { %558 = vsyncadd (%p525_p3), [#allocation3], 4294967280 }
   0xd   : > { %168 = sfence }
   0xe   : > { %s430_s18 = sshll.u32 %s423_s13, 4  ;;  %s210_s19 = sld [smem:[#allocation2]]  ;;  %vm326_vm0 = vcmask 523264  }
   0xf   : > { %p193_p6 = scmp.lt.s32.totalorder %s430_s18, 31  ;;  %s436_s20 = sld [smem:[#allocation2 + $0x1]] }
  0x11   : > { %s702_s18 = smov (!%p193_p6, %s430_s18), 31 }
  0x12   : > { %s431_s21 = sshll.u32 %s702_s18, 2  ;;  %s435_s28 = sshll.u32 %s702_s18, 3 }
  0x13   : > { %s598_s24 = scalar_lea.vmem %s698_s1, %s431_s21  ;;  %s603_s27 = scalar_lea.vmem %s699_s2, %s431_s21 }
  0x14   : > { %v605_v0 = vstv %s210_s19  ;;  %v440_v1 = vld [vmem:[%s598_s24] sm:$0xff]   ;;  %v503_v4 = vld [vmem:[%s598_s24 + $0x8] sm:$0xff]   ;;  %v504_v14 = vld [vmem:[%s598_s24 + $0x10] sm:$0xff]   ;;  %s622_s4 = scalar_lea.vmem %s700_s3, %s435_s28 }
  0x15   : > { %v472_v2 = vld [vmem:[%s603_s27] sm:$0xff]   ;;  %v609_v3 = vstv %s436_s20  ;;  %v441_v5 = vunpack.c.l.bf16 %v440_v1  ;;  %v442_v7 = vunpack.c.h.bf16 %v440_v1  ;;  %v510_v9 = vld [vmem:[%s603_s27 + $0x8] sm:$0xff]   ;;  %v445_v10 = vunpack.c.l.bf16 %v503_v4  ;;  %v511_v15 = vld [vmem:[%s603_s27 + $0x10] sm:$0xff]  }
  0x16   : > { %v473_v6 = vunpack.c.l.bf16 %v472_v2  ;;  %v474_v8 = vunpack.c.h.bf16 %v472_v2  ;;  %v477_v11 = vunpack.c.l.bf16 %v510_v9  ;;  %v446_v12 = vunpack.c.h.bf16 %v503_v4  ;;  %v505_v24 = vld [vmem:[%s598_s24 + $0x18] sm:$0xff]   ;;  %v506_v34 = vld [vmem:[%s598_s24 + $0x20] sm:$0xff]   ;;  %v507_v48 = vld [vmem:[%s598_s24 + $0x28] sm:$0xff]  }
  0x17   : > { %v478_v13 = vunpack.c.h.bf16 %v510_v9  ;;  %v244_v16 = vmul.f32 %v441_v5, %v605_v0  ;;  %v245_v18 = vmul.f32 %v442_v7, %v605_v0  ;;  %v246_v20 = vmul.f32 %v445_v10, %v605_v0  ;;  %v512_v25 = vld [vmem:[%s603_s27 + $0x18] sm:$0xff]   ;;  %v513_v39 = vld [vmem:[%s603_s27 + $0x20] sm:$0xff]   ;;  %v514_v49 = vld [vmem:[%s603_s27 + $0x28] sm:$0xff]  }
  0x18   : > { %v294_v17 = vmul.f32 %v473_v6, %v609_v3  ;;  %v295_v19 = vmul.f32 %v474_v8, %v609_v3  ;;  %v296_v21 = vmul.f32 %v477_v11, %v609_v3  ;;  %v247_v22 = vmul.f32 %v446_v12, %v605_v0  ;;  %v508_v58 = vld [vmem:[%s598_s24 + $0x30] sm:$0xff]   ;;  %v509_v10 = vld [vmem:[%s598_s24 + $0x38] sm:$0xff]  }
  0x19   : > { %v297_v23 = vmul.f32 %v478_v13, %v609_v3  ;;  %v449_v28 = vunpack.c.l.bf16 %v504_v14  ;;  %v481_v29 = vunpack.c.l.bf16 %v511_v15  ;;  %v450_v32 = vunpack.c.h.bf16 %v504_v14  ;;  %v515_v63 = vld [vmem:[%s603_s27 + $0x30] sm:$0xff]   ;;  %v516_v11 = vld [vmem:[%s603_s27 + $0x38] sm:$0xff]  }
  0x1a   : > { %v310_v26 = vadd.f32 %v294_v17, %v244_v16  ;;  %v311_v27 = vadd.f32 %v295_v19, %v245_v18  ;;  %v312_v30 = vadd.f32 %v296_v21, %v246_v20  ;;  %v482_v33 = vunpack.c.h.bf16 %v511_v15 }
  0x1b   : > { %v313_v31 = vadd.f32 %v297_v23, %v247_v22  ;;  %v248_v35 = vmul.f32 %v449_v28, %v605_v0  ;;  %v298_v36 = vmul.f32 %v481_v29, %v609_v3  ;;  %v453_v37 = vunpack.c.l.bf16 %v505_v24 }
  0x1c   : > { %327 = vst.msk [vmem:[%s622_s4] sm:$0xff] %vm326_vm0, %v310_v26  ;;  %v485_v38 = vunpack.c.l.bf16 %v512_v25  ;;  %v249_v40 = vmul.f32 %v450_v32, %v605_v0  ;;  %v299_v41 = vmul.f32 %v482_v33, %v609_v3  ;;  %v454_v42 = vunpack.c.h.bf16 %v505_v24 }
  0x1d   : > { %328 = vst.msk [vmem:[%s622_s4 + $0x8] sm:$0xff] %vm326_vm0, %v311_v27  ;;  %v486_v43 = vunpack.c.h.bf16 %v512_v25  ;;  %v314_v44 = vadd.f32 %v298_v36, %v248_v35  ;;  %v250_v45 = vmul.f32 %v453_v37, %v605_v0  ;;  %v457_v47 = vunpack.c.l.bf16 %v506_v34 }
  0x1e   : > { %329 = vst.msk [vmem:[%s622_s4 + $0x10] sm:$0xff] %vm326_vm0, %v312_v30  ;;  %v300_v46 = vmul.f32 %v485_v38, %v609_v3  ;;  %v315_v50 = vadd.f32 %v299_v41, %v249_v40  ;;  %v251_v51 = vmul.f32 %v454_v42, %v605_v0  ;;  %v489_v53 = vunpack.c.l.bf16 %v513_v39 }
  0x1f   : > { %330 = vst.msk [vmem:[%s622_s4 + $0x18] sm:$0xff] %vm326_vm0, %v313_v31  ;;  %v301_v52 = vmul.f32 %v486_v43, %v609_v3  ;;  %v252_v55 = vmul.f32 %v457_v47, %v605_v0  ;;  %v458_v56 = vunpack.c.h.bf16 %v506_v34  ;;  %v490_v57 = vunpack.c.h.bf16 %v513_v39 }
  0x20   : > { %331 = vst.msk [vmem:[%s622_s4 + $0x20] sm:$0xff] %vm326_vm0, %v314_v44  ;;  %v316_v54 = vadd.f32 %v300_v46, %v250_v45  ;;  %v302_v60 = vmul.f32 %v489_v53, %v609_v3  ;;  %v461_v61 = vunpack.c.l.bf16 %v507_v48  ;;  %v493_v62 = vunpack.c.l.bf16 %v514_v49 }
  0x21   : > { %332 = vst.msk [vmem:[%s622_s4 + $0x28] sm:$0xff] %vm326_vm0, %v315_v50  ;;  %v317_v59 = vadd.f32 %v301_v52, %v251_v51  ;;  %v253_v1 = vmul.f32 %v458_v56, %v605_v0  ;;  %v303_v2 = vmul.f32 %v490_v57, %v609_v3  ;;  %v462_v4 = vunpack.c.h.bf16 %v507_v48 }
  0x22   : > { %333 = vst.msk [vmem:[%s622_s4 + $0x30] sm:$0xff] %vm326_vm0, %v316_v54  ;;  %v494_v5 = vunpack.c.h.bf16 %v514_v49  ;;  %v318_v6 = vadd.f32 %v302_v60, %v252_v55  ;;  %v254_v7 = vmul.f32 %v461_v61, %v605_v0  ;;  %v304_v8 = vmul.f32 %v493_v62, %v609_v3 }
  0x23   : > { %334 = vst.msk [vmem:[%s622_s4 + $0x38] sm:$0xff] %vm326_vm0, %v317_v59  ;;  %v465_v9 = vunpack.c.l.bf16 %v508_v58  ;;  %v319_v12 = vadd.f32 %v303_v2, %v253_v1  ;;  %v255_v13 = vmul.f32 %v462_v4, %v605_v0  ;;  %v497_v15 = vunpack.c.l.bf16 %v515_v63 }
  0x24   : > { %v305_v14 = vmul.f32 %v494_v5, %v609_v3  ;;  %335 = vst.msk [vmem:[%s622_s4 + $0x40] sm:$0xff] %vm326_vm0, %v318_v6  ;;  %v320_v16 = vadd.f32 %v304_v8, %v254_v7  ;;  %v466_v18 = vunpack.c.h.bf16 %v508_v58  ;;  %v498_v19 = vunpack.c.h.bf16 %v515_v63 }
  0x25   : > { %v256_v17 = vmul.f32 %v465_v9, %v605_v0  ;;  %336 = vst.msk [vmem:[%s622_s4 + $0x48] sm:$0xff] %vm326_vm0, %v319_v12  ;;  %v306_v21 = vmul.f32 %v497_v15, %v609_v3  ;;  %v469_v22 = vunpack.c.l.bf16 %v509_v10  ;;  %v501_v23 = vunpack.c.l.bf16 %v516_v11 }
  0x26   : > { %v321_v20 = vadd.f32 %v305_v14, %v255_v13  ;;  %337 = vst.msk [vmem:[%s622_s4 + $0x50] sm:$0xff] %vm326_vm0, %v320_v16  ;;  %v257_v24 = vmul.f32 %v466_v18, %v605_v0  ;;  %v307_v25 = vmul.f32 %v498_v19, %v609_v3  ;;  %v470_v26 = vunpack.c.h.bf16 %v509_v10 }
  0x27   : > { %v502_v27 = vunpack.c.h.bf16 %v516_v11  ;;  %v322_v28 = vadd.f32 %v306_v21, %v256_v17  ;;  %v258_v29 = vmul.f32 %v469_v22, %v605_v0  ;;  %v308_v30 = vmul.f32 %v501_v23, %v609_v3 }
  0x28   : > { %338 = vst.msk [vmem:[%s622_s4 + $0x58] sm:$0xff] %vm326_vm0, %v321_v20  ;;  %v323_v31 = vadd.f32 %v307_v25, %v257_v24  ;;  %v259_v32 = vmul.f32 %v470_v26, %v605_v0 }
  0x29   : > { %v309_v33 = vmul.f32 %v502_v27, %v609_v3  ;;  %339 = vst.msk [vmem:[%s622_s4 + $0x60] sm:$0xff] %vm326_vm0, %v322_v28  ;;  %v324_v34 = vadd.f32 %v308_v30, %v258_v29 }
  0x2a   : > { %340 = vst.msk [vmem:[%s622_s4 + $0x68] sm:$0xff] %vm326_vm0, %v323_v31 }
  0x2b   : > { %v325_v35 = vadd.f32 %v309_v33, %v259_v32  ;;  %341 = vst.msk [vmem:[%s622_s4 + $0x70] sm:$0xff] %vm326_vm0, %v324_v34 }
  0x2d   : > { %342 = vst.msk [vmem:[%s622_s4 + $0x78] sm:$0xff] %vm326_vm0, %v325_v35 }
  0x2e PF: > { %s14_s12 = sadd.s32 1, %s561_s12  }
  0x2f   : > { %p11_p7 = scmp.ge.s32.totalorder %s14_s12, 4  }
  0x31   :  { %13 = sbr.rel (!%p11_p7) target bundleno = 1 (0x1), region = 70 }
  0x36   :  { %365 = vsyncpa [#allocation3], 1 }
  0x37   :  { %367 = vsyncpa [#allocation3 + $0x1], 1 }

</bundles_post_ra>
